<compile_context>
chip_gen: v7x
topology: tpu7x:2x2x1
jax: 0.10.0
libtpu: 0.0.40
codegen_flags: <defaults>
</compile_context>

<pallas_src>
import math
import functools

import jax
import jax.numpy as jnp
from jax.experimental import pallas as pl
from jax.experimental.pallas import tpu as pltpu


# ------------------------------ fused kernel ----------------------------------
def _fused_kernel(*refs, n_layers, hidden_dim, inv_sqrt_dk):
    """refs = [x, (w_ih_t, w_hh_t, b)*n_layers, w_fc_t, b_fc, out]."""
    x_ref = refs[0]
    layer_refs = refs[1:1 + 3 * n_layers]
    wfc_ref = refs[1 + 3 * n_layers]
    bfc_ref = refs[2 + 3 * n_layers]
    out_ref = refs[3 + 3 * n_layers]

    B, T, in_dim = x_ref.shape
    H = hidden_dim

    # Batch-first rows (b-major, t-minor). The hoisted input projection is
    # row-order agnostic, so x needs no time-major relayout at all.
    inp_2d = x_ref[...].astype(jnp.float32).reshape(B * T, in_dim)

    h_lasts = []
    for l in range(n_layers):
        wih_ref = layer_refs[3 * l]       # (in, 4H)
        whh_ref = layer_refs[3 * l + 1]   # (H, 4H)
        b_ref = layer_refs[3 * l + 2]     # (1, 4H)

        # Hoisted, time-batched input projection: one MXU pass with M = B*T
        # rows instead of T matmuls with M = B on the serial path.
        gx = (jnp.dot(inp_2d, wih_ref[...], preferred_element_type=jnp.float32)
              + b_ref[...]).reshape(B, T, 4 * H)

        h = jnp.zeros((B, H), jnp.float32)
        c = jnp.zeros((B, H), jnp.float32)
        hs = []
        # Static unroll over the (small, static) time axis: gx and h/c stay in
        # vregs, every slice is static — no VMEM scratch round-trip per step.
        for t in range(T):
            gates = gx[:, t, :] + jnp.dot(
                h, whh_ref[...], preferred_element_type=jnp.float32)   # (B,4H)
            # PyTorch gate order: i, f, g, o. One full-width sigmoid over the
            # whole (B,4H) slab (g's sigmoid is discarded) beats three
            # 32-lane sliced sigmoids.
            s = jax.nn.sigmoid(gates)
            g = jnp.tanh(gates[:, 2 * H:3 * H])
            i = s[:, 0:H]
            f = s[:, H:2 * H]
            o = s[:, 3 * H:4 * H]
            c = f * c + i * g
            h = o * jnp.tanh(c)
            if l < n_layers - 1:
                hs.append(h)                     # inter-layer seq kept in vregs
        h_lasts.append(h)                        # final hidden per layer (B, H)
        if l < n_layers - 1:
            inp_2d = jnp.stack(hs, axis=1).reshape(B * T, H)   # (B,T,H) flat

    # ---- attention over the per-layer final hidden states (query == keys in
    # eval mode), fully batched over B; L = n_layers is static & tiny. --------
    # TODO(synk): for larger n_layers compute the LxL scores as one batched
    # MXU matmul over stacked h_lasts instead of L^2 cross-lane reductions.
    L = n_layers
    q = [h * inv_sqrt_dk for h in h_lasts]       # fold 1/sqrt(d_k) once per row
    scores = [[jnp.sum(q[i] * h_lasts[j], axis=-1, keepdims=True)
               for j in range(L)] for i in range(L)]              # (B, 1) each
    col_sum = [jnp.zeros((B, 1), jnp.float32) for _ in range(L)]
    for i in range(L):
        m_i = scores[i][0]
        for j in range(1, L):
            m_i = jnp.maximum(m_i, scores[i][j])
        e_i = [jnp.exp(scores[i][j] - m_i) for j in range(L)]
        denom = e_i[0]
        for j in range(1, L):
            denom = denom + e_i[j]
        inv_d = pl.reciprocal(denom, approx=True)       # EUP slot
        inv_d = inv_d * (2.0 - denom * inv_d)           # one Newton refinement
        for j in range(L):
            col_sum[j] = col_sum[j] + e_i[j] * inv_d    # sum_i alpha[b, i, j]
    # context[b, h] = sum_j (sum_i alpha[b, i, j]) * h_n[b, j, h]
    context = col_sum[0] * h_lasts[0]
    for j in range(1, L):
        context = context + col_sum[j] * h_lasts[j]                  # (B, H)

    logit = (jnp.dot(context, wfc_ref[...], preferred_element_type=jnp.float32)
             + bfc_ref[...])                                 # (B, node_size)
    out_ref[...] = logit.astype(out_ref.dtype)


# --------------------------------- wrapper ------------------------------------
def prepare_params(params):
    """ONE-TIME weight fold/transpose (call once at setup, not per forward)."""
    layers = []
    for layer in params["lstm"]:
        layers.append(dict(
            w_ih_t=jnp.asarray(layer["w_ih"]).T,                     # (in, 4H)
            w_hh_t=jnp.asarray(layer["w_hh"]).T,                     # (H, 4H)
            b=(layer["b_ih"] + layer["b_hh"]).reshape(1, -1),        # (1, 4H)
        ))
    return dict(lstm=layers,
                fc_w_t=jnp.asarray(params["fc_w"]).T,                # (H, node)
                fc_b=params["fc_b"].reshape(1, -1))                  # (1, node)


def lstm_attention_forward(x, prepared):
    """x: (B, T, input_size) batch-first, like the PyTorch module."""
    B, T, in_dim = x.shape
    layers = prepared["lstm"]
    n_layers = len(layers)
    H = layers[0]["w_hh_t"].shape[0]
    node_size = prepared["fc_w_t"].shape[1]

    args = [x]
    in_specs = [pl.BlockSpec((B, T, in_dim), lambda i: (0, 0, 0))]
    for layer in layers:
        lin = layer["w_ih_t"].shape[0]
        args += [layer["w_ih_t"], layer["w_hh_t"], layer["b"]]
        in_specs += [pl.BlockSpec((lin, 4 * H), lambda i: (0, 0)),
                     pl.BlockSpec((H, 4 * H), lambda i: (0, 0)),
                     pl.BlockSpec((1, 4 * H), lambda i: (0, 0))]
    args += [prepared["fc_w_t"], prepared["fc_b"]]
    in_specs += [pl.BlockSpec((H, node_size), lambda i: (0, 0)),
                 pl.BlockSpec((1, node_size), lambda i: (0, 0))]

    kernel = functools.partial(_fused_kernel, n_layers=n_layers,
                               hidden_dim=H, inv_sqrt_dk=1.0 / math.sqrt(H))

    return pl.pallas_call(
        kernel,
        out_shape=jax.ShapeDtypeStruct((B, node_size), x.dtype),
        grid_spec=pltpu.PrefetchScalarGridSpec(
            num_scalar_prefetch=0,
            grid=(1,),                      # single fused invocation
            in_specs=in_specs,
            out_specs=pl.BlockSpec((B, node_size), lambda i: (0, 0)),
        ),
        compiler_params=pltpu.CompilerParams(
            dimension_semantics=("arbitrary",),
            vmem_limit_bytes=32 * 1024 * 1024),
    )(*args)


# ------------------------------ params / reference ----------------------------
def init_params(key, node_size, input_size, hidden_dim, n_layers):
    bound = 1.0 / math.sqrt(hidden_dim)
    layers = []
    for l in range(n_layers):
        in_dim = input_size if l == 0 else hidden_dim
        key, k1, k2, k3, k4 = jax.random.split(key, 5)
        layers.append(dict(
            w_ih=jax.random.uniform(k1, (4 * hidden_dim, in_dim), jnp.float32, -bound, bound),
            w_hh=jax.random.uniform(k2, (4 * hidden_dim, hidden_dim), jnp.float32, -bound, bound),
            b_ih=jax.random.uniform(k3, (4 * hidden_dim,), jnp.float32, -bound, bound),
            b_hh=jax.random.uniform(k4, (4 * hidden_dim,), jnp.float32, -bound, bound),
        ))
    key, kf1, kf2 = jax.random.split(key, 3)
    fc_w = jax.random.uniform(kf1, (node_size, hidden_dim), jnp.float32, -bound, bound)
    fc_b = jax.random.uniform(kf2, (node_size,), jnp.float32, -bound, bound)
    return dict(lstm=layers, fc_w=fc_w, fc_b=fc_b)


def reference_forward(x, params):
    """Pure-JAX reference replicating the PyTorch eval-mode forward."""
    x_tm = jnp.transpose(x, (1, 0, 2))

    def run_layer(inp, layer):
        H = layer["w_hh"].shape[1]
        B = inp.shape[1]

        def step(carry, x_t):
            h, c = carry
            gates = (x_t @ layer["w_ih"].T + h @ layer["w_hh"].T
                     + layer["b_ih"] + layer["b_hh"])
            i, f, g, o = jnp.split(gates, 4, axis=-1)
            i, f, o = jax.nn.sigmoid(i), jax.nn.sigmoid(f), jax.nn.sigmoid(o)
            g = jnp.tanh(g)
            c = f * c + i * g
            h = o * jnp.tanh(c)
            return (h, c), h

        init = (jnp.zeros((B, H), jnp.float32), jnp.zeros((B, H), jnp.float32))
        (h_last, _), hs = jax.lax.scan(step, init, inp)
        return hs, h_last

    inp = x_tm
    h_lasts = []
    for layer in params["lstm"]:
        hs, h_last = run_layer(inp, layer)
        h_lasts.append(h_last)
        inp = hs
    h_n = jnp.stack(h_lasts, axis=1)                 # (B, L, H)
    d_k = h_n.shape[-1]
    scores = jnp.einsum('blh,bmh->blm', h_n, h_n) / math.sqrt(d_k)
    alpha = jax.nn.softmax(scores, axis=-1)
    context = jnp.einsum('blm,bmh->blh', alpha, h_n).sum(axis=1)
    return context @ params["fc_w"].T + params["fc_b"]


# ----------------------------------- main -------------------------------------
if __name__ == "__main__":
    node_size, input_size, hidden_dim, n_layers = 4, 8, 32, 2
    B, T = 2, 8

    key = jax.random.PRNGKey(0)
    kx, kp = jax.random.split(key)
    x = jax.random.normal(kx, (B, T, input_size), jnp.float32)
    params = init_params(kp, node_size, input_size, hidden_dim, n_layers)

    # One-time weight fold/transpose (kept out of the per-call forward).
    prepared = jax.tree_util.tree_map(jax.block_until_ready,
                                      prepare_params(params))

    fwd = jax.jit(lstm_attention_forward)
    out = fwd(x, prepared)
    out = jax.block_until_ready(out)

    ref = reference_forward(x, params)
    assert out.shape == (B, node_size), out.shape
    assert jnp.allclose(out, ref, atol=1e-3, rtol=1e-3), (out, ref)

    print("KERNEL_OK")
</pallas_src>

<mosaic_0001>
module attributes {stable_mosaic.version = 11 : i64} {
  func.func @_fused_kernel(%arg0: i32, %arg1: memref<2x8x8xf32, #tpu.memory_space<vmem>>, %arg2: memref<8x128xf32, #tpu.memory_space<vmem>>, %arg3: memref<32x128xf32, #tpu.memory_space<vmem>>, %arg4: memref<1x128xf32, #tpu.memory_space<vmem>>, %arg5: memref<32x128xf32, #tpu.memory_space<vmem>>, %arg6: memref<32x128xf32, #tpu.memory_space<vmem>>, %arg7: memref<1x128xf32, #tpu.memory_space<vmem>>, %arg8: memref<32x4xf32, #tpu.memory_space<vmem>>, %arg9: memref<1x4xf32, #tpu.memory_space<vmem>>, %arg10: memref<2x4xf32, #tpu.memory_space<vmem>>) attributes {dimension_semantics = [#tpu.dimension_semantics<arbitrary>], iteration_bounds = array<i64: 1>, scalar_prefetch = 0 : i64, scratch_operands = 0 : i64, tpu.core_type = #tpu.core_type<tc>, window_params = [{pipeline_mode = #tpu.pipeline_mode<synchronous>, transform_indices = @transform_0, window_bounds = array<i64: 2, 8, 8>}, {pipeline_mode = #tpu.pipeline_mode<synchronous>, transform_indices = @transform_1, window_bounds = array<i64: 8, 128>}, {pipeline_mode = #tpu.pipeline_mode<synchronous>, transform_indices = @transform_2, window_bounds = array<i64: 32, 128>}, {pipeline_mode = #tpu.pipeline_mode<synchronous>, transform_indices = @transform_3, window_bounds = array<i64: 1, 128>}, {pipeline_mode = #tpu.pipeline_mode<synchronous>, transform_indices = @transform_4, window_bounds = array<i64: 32, 128>}, {pipeline_mode = #tpu.pipeline_mode<synchronous>, transform_indices = @transform_5, window_bounds = array<i64: 32, 128>}, {pipeline_mode = #tpu.pipeline_mode<synchronous>, transform_indices = @transform_6, window_bounds = array<i64: 1, 128>}, {pipeline_mode = #tpu.pipeline_mode<synchronous>, transform_indices = @transform_7, window_bounds = array<i64: 32, 4>}, {pipeline_mode = #tpu.pipeline_mode<synchronous>, transform_indices = @transform_8, window_bounds = array<i64: 1, 4>}, {pipeline_mode = #tpu.pipeline_mode<synchronous>, transform_indices = @transform_9, window_bounds = array<i64: 2, 4>}]} {
    %c0 = arith.constant 0 : index
    %c0_0 = arith.constant 0 : index
    %c0_1 = arith.constant 0 : index
    %0 = vector.load %arg1[%c0, %c0_0, %c0_1] : memref<2x8x8xf32, #tpu.memory_space<vmem>>, vector<2x8x8xf32>
    %1 = vector.shape_cast %0 : vector<2x8x8xf32> to vector<16x8xf32>
    %c0_2 = arith.constant 0 : index
    %c0_3 = arith.constant 0 : index
    %2 = vector.load %arg2[%c0_2, %c0_3] : memref<8x128xf32, #tpu.memory_space<vmem>>, vector<8x128xf32>
    %cst = arith.constant dense<0.000000e+00> : vector<16x128xf32>
    %3 = tpu.matmul %1, %2, %cst {dimension_numbers = #tpu.dot_dimension_numbers<[1], [0], [0], [1], [0, 0, 1, 1], [], []>} : vector<16x8xf32>, vector<8x128xf32>, vector<16x128xf32> -> vector<16x128xf32>
    %c0_4 = arith.constant 0 : index
    %c0_5 = arith.constant 0 : index
    %4 = vector.load %arg4[%c0_4, %c0_5] : memref<1x128xf32, #tpu.memory_space<vmem>>, vector<1x128xf32>
    %5 = vector.broadcast %4 : vector<1x128xf32> to vector<16x128xf32>
    %6 = arith.addf %3, %5 : vector<16x128xf32>
    %7 = vector.shape_cast %6 : vector<16x128xf32> to vector<2x8x128xf32>
    %cst_6 = arith.constant 0.000000e+00 : f32
    %8 = vector.broadcast %cst_6 : f32 to vector<2x32xf32>
    %cst_7 = arith.constant 0.000000e+00 : f32
    %9 = vector.broadcast %cst_7 : f32 to vector<2x32xf32>
    %10 = vector.extract_strided_slice %7 {offsets = [0, 0, 0], sizes = [2, 1, 128], strides = [1, 1, 1]} : vector<2x8x128xf32> to vector<2x1x128xf32>
    %11 = vector.shape_cast %10 : vector<2x1x128xf32> to vector<2x128xf32>
    %c0_8 = arith.constant 0 : index
    %c0_9 = arith.constant 0 : index
    %12 = vector.load %arg3[%c0_8, %c0_9] : memref<32x128xf32, #tpu.memory_space<vmem>>, vector<32x128xf32>
    %cst_10 = arith.constant dense<0.000000e+00> : vector<2x128xf32>
    %13 = tpu.matmul %8, %12, %cst_10 {dimension_numbers = #tpu.dot_dimension_numbers<[1], [0], [0], [1], [0, 0, 1, 1], [], []>} : vector<2x32xf32>, vector<32x128xf32>, vector<2x128xf32> -> vector<2x128xf32>
    %14 = arith.addf %11, %13 : vector<2x128xf32>
    %15 = arith.negf %14 : vector<2x128xf32>
    %16 = math.exp %15 : vector<2x128xf32>
    %cst_11 = arith.constant 1.000000e+00 : f32
    %17 = vector.broadcast %cst_11 : f32 to vector<2x128xf32>
    %18 = arith.addf %17, %16 : vector<2x128xf32>
    %19 = arith.divf %17, %18 : vector<2x128xf32>
    %20 = vector.extract_strided_slice %14 {offsets = [0, 64], sizes = [2, 32], strides = [1, 1]} : vector<2x128xf32> to vector<2x32xf32>
    %21 = math.tanh %20 : vector<2x32xf32>
    %22 = vector.extract_strided_slice %19 {offsets = [0, 0], sizes = [2, 32], strides = [1, 1]} : vector<2x128xf32> to vector<2x32xf32>
    %23 = vector.extract_strided_slice %19 {offsets = [0, 32], sizes = [2, 32], strides = [1, 1]} : vector<2x128xf32> to vector<2x32xf32>
    %24 = vector.extract_strided_slice %19 {offsets = [0, 96], sizes = [2, 32], strides = [1, 1]} : vector<2x128xf32> to vector<2x32xf32>
    %25 = arith.mulf %23, %9 : vector<2x32xf32>
    %26 = arith.mulf %22, %21 : vector<2x32xf32>
    %27 = arith.addf %25, %26 : vector<2x32xf32>
    %28 = math.tanh %27 : vector<2x32xf32>
    %29 = arith.mulf %24, %28 : vector<2x32xf32>
    %30 = vector.extract_strided_slice %7 {offsets = [0, 1, 0], sizes = [2, 1, 128], strides = [1, 1, 1]} : vector<2x8x128xf32> to vector<2x1x128xf32>
    %31 = vector.shape_cast %30 : vector<2x1x128xf32> to vector<2x128xf32>
    %c0_12 = arith.constant 0 : index
    %c0_13 = arith.constant 0 : index
    %32 = vector.load %arg3[%c0_12, %c0_13] : memref<32x128xf32, #tpu.memory_space<vmem>>, vector<32x128xf32>
    %cst_14 = arith.constant dense<0.000000e+00> : vector<2x128xf32>
    %33 = tpu.matmul %29, %32, %cst_14 {dimension_numbers = #tpu.dot_dimension_numbers<[1], [0], [0], [1], [0, 0, 1, 1], [], []>} : vector<2x32xf32>, vector<32x128xf32>, vector<2x128xf32> -> vector<2x128xf32>
    %34 = arith.addf %31, %33 : vector<2x128xf32>
    %35 = arith.negf %34 : vector<2x128xf32>
    %36 = math.exp %35 : vector<2x128xf32>
    %cst_15 = arith.constant 1.000000e+00 : f32
    %37 = vector.broadcast %cst_15 : f32 to vector<2x128xf32>
    %38 = arith.addf %37, %36 : vector<2x128xf32>
    %39 = arith.divf %37, %38 : vector<2x128xf32>
    %40 = vector.extract_strided_slice %34 {offsets = [0, 64], sizes = [2, 32], strides = [1, 1]} : vector<2x128xf32> to vector<2x32xf32>
    %41 = math.tanh %40 : vector<2x32xf32>
    %42 = vector.extract_strided_slice %39 {offsets = [0, 0], sizes = [2, 32], strides = [1, 1]} : vector<2x128xf32> to vector<2x32xf32>
    %43 = vector.extract_strided_slice %39 {offsets = [0, 32], sizes = [2, 32], strides = [1, 1]} : vector<2x128xf32> to vector<2x32xf32>
    %44 = vector.extract_strided_slice %39 {offsets = [0, 96], sizes = [2, 32], strides = [1, 1]} : vector<2x128xf32> to vector<2x32xf32>
    %45 = arith.mulf %43, %27 : vector<2x32xf32>
    %46 = arith.mulf %42, %41 : vector<2x32xf32>
    %47 = arith.addf %45, %46 : vector<2x32xf32>
    %48 = math.tanh %47 : vector<2x32xf32>
    %49 = arith.mulf %44, %48 : vector<2x32xf32>
    %50 = vector.extract_strided_slice %7 {offsets = [0, 2, 0], sizes = [2, 1, 128], strides = [1, 1, 1]} : vector<2x8x128xf32> to vector<2x1x128xf32>
    %51 = vector.shape_cast %50 : vector<2x1x128xf32> to vector<2x128xf32>
    %c0_16 = arith.constant 0 : index
    %c0_17 = arith.constant 0 : index
    %52 = vector.load %arg3[%c0_16, %c0_17] : memref<32x128xf32, #tpu.memory_space<vmem>>, vector<32x128xf32>
    %cst_18 = arith.constant dense<0.000000e+00> : vector<2x128xf32>
    %53 = tpu.matmul %49, %52, %cst_18 {dimension_numbers = #tpu.dot_dimension_numbers<[1], [0], [0], [1], [0, 0, 1, 1], [], []>} : vector<2x32xf32>, vector<32x128xf32>, vector<2x128xf32> -> vector<2x128xf32>
    %54 = arith.addf %51, %53 : vector<2x128xf32>
    %55 = arith.negf %54 : vector<2x128xf32>
    %56 = math.exp %55 : vector<2x128xf32>
    %cst_19 = arith.constant 1.000000e+00 : f32
    %57 = vector.broadcast %cst_19 : f32 to vector<2x128xf32>
    %58 = arith.addf %57, %56 : vector<2x128xf32>
    %59 = arith.divf %57, %58 : vector<2x128xf32>
    %60 = vector.extract_strided_slice %54 {offsets = [0, 64], sizes = [2, 32], strides = [1, 1]} : vector<2x128xf32> to vector<2x32xf32>
    %61 = math.tanh %60 : vector<2x32xf32>
    %62 = vector.extract_strided_slice %59 {offsets = [0, 0], sizes = [2, 32], strides = [1, 1]} : vector<2x128xf32> to vector<2x32xf32>
    %63 = vector.extract_strided_slice %59 {offsets = [0, 32], sizes = [2, 32], strides = [1, 1]} : vector<2x128xf32> to vector<2x32xf32>
    %64 = vector.extract_strided_slice %59 {offsets = [0, 96], sizes = [2, 32], strides = [1, 1]} : vector<2x128xf32> to vector<2x32xf32>
    %65 = arith.mulf %63, %47 : vector<2x32xf32>
    %66 = arith.mulf %62, %61 : vector<2x32xf32>
    %67 = arith.addf %65, %66 : vector<2x32xf32>
    %68 = math.tanh %67 : vector<2x32xf32>
    %69 = arith.mulf %64, %68 : vector<2x32xf32>
    %70 = vector.extract_strided_slice %7 {offsets = [0, 3, 0], sizes = [2, 1, 128], strides = [1, 1, 1]} : vector<2x8x128xf32> to vector<2x1x128xf32>
    %71 = vector.shape_cast %70 : vector<2x1x128xf32> to vector<2x128xf32>
    %c0_20 = arith.constant 0 : index
    %c0_21 = arith.constant 0 : index
    %72 = vector.load %arg3[%c0_20, %c0_21] : memref<32x128xf32, #tpu.memory_space<vmem>>, vector<32x128xf32>
    %cst_22 = arith.constant dense<0.000000e+00> : vector<2x128xf32>
    %73 = tpu.matmul %69, %72, %cst_22 {dimension_numbers = #tpu.dot_dimension_numbers<[1], [0], [0], [1], [0, 0, 1, 1], [], []>} : vector<2x32xf32>, vector<32x128xf32>, vector<2x128xf32> -> vector<2x128xf32>
    %74 = arith.addf %71, %73 : vector<2x128xf32>
    %75 = arith.negf %74 : vector<2x128xf32>
    %76 = math.exp %75 : vector<2x128xf32>
    %cst_23 = arith.constant 1.000000e+00 : f32
    %77 = vector.broadcast %cst_23 : f32 to vector<2x128xf32>
    %78 = arith.addf %77, %76 : vector<2x128xf32>
    %79 = arith.divf %77, %78 : vector<2x128xf32>
    %80 = vector.extract_strided_slice %74 {offsets = [0, 64], sizes = [2, 32], strides = [1, 1]} : vector<2x128xf32> to vector<2x32xf32>
    %81 = math.tanh %80 : vector<2x32xf32>
    %82 = vector.extract_strided_slice %79 {offsets = [0, 0], sizes = [2, 32], strides = [1, 1]} : vector<2x128xf32> to vector<2x32xf32>
    %83 = vector.extract_strided_slice %79 {offsets = [0, 32], sizes = [2, 32], strides = [1, 1]} : vector<2x128xf32> to vector<2x32xf32>
    %84 = vector.extract_strided_slice %79 {offsets = [0, 96], sizes = [2, 32], strides = [1, 1]} : vector<2x128xf32> to vector<2x32xf32>
    %85 = arith.mulf %83, %67 : vector<2x32xf32>
    %86 = arith.mulf %82, %81 : vector<2x32xf32>
    %87 = arith.addf %85, %86 : vector<2x32xf32>
    %88 = math.tanh %87 : vector<2x32xf32>
    %89 = arith.mulf %84, %88 : vector<2x32xf32>
    %90 = vector.extract_strided_slice %7 {offsets = [0, 4, 0], sizes = [2, 1, 128], strides = [1, 1, 1]} : vector<2x8x128xf32> to vector<2x1x128xf32>
    %91 = vector.shape_cast %90 : vector<2x1x128xf32> to vector<2x128xf32>
    %c0_24 = arith.constant 0 : index
    %c0_25 = arith.constant 0 : index
    %92 = vector.load %arg3[%c0_24, %c0_25] : memref<32x128xf32, #tpu.memory_space<vmem>>, vector<32x128xf32>
    %cst_26 = arith.constant dense<0.000000e+00> : vector<2x128xf32>
    %93 = tpu.matmul %89, %92, %cst_26 {dimension_numbers = #tpu.dot_dimension_numbers<[1], [0], [0], [1], [0, 0, 1, 1], [], []>} : vector<2x32xf32>, vector<32x128xf32>, vector<2x128xf32> -> vector<2x128xf32>
    %94 = arith.addf %91, %93 : vector<2x128xf32>
    %95 = arith.negf %94 : vector<2x128xf32>
    %96 = math.exp %95 : vector<2x128xf32>
    %cst_27 = arith.constant 1.000000e+00 : f32
    %97 = vector.broadcast %cst_27 : f32 to vector<2x128xf32>
    %98 = arith.addf %97, %96 : vector<2x128xf32>
    %99 = arith.divf %97, %98 : vector<2x128xf32>
    %100 = vector.extract_strided_slice %94 {offsets = [0, 64], sizes = [2, 32], strides = [1, 1]} : vector<2x128xf32> to vector<2x32xf32>
    %101 = math.tanh %100 : vector<2x32xf32>
    %102 = vector.extract_strided_slice %99 {offsets = [0, 0], sizes = [2, 32], strides = [1, 1]} : vector<2x128xf32> to vector<2x32xf32>
    %103 = vector.extract_strided_slice %99 {offsets = [0, 32], sizes = [2, 32], strides = [1, 1]} : vector<2x128xf32> to vector<2x32xf32>
    %104 = vector.extract_strided_slice %99 {offsets = [0, 96], sizes = [2, 32], strides = [1, 1]} : vector<2x128xf32> to vector<2x32xf32>
    %105 = arith.mulf %103, %87 : vector<2x32xf32>
    %106 = arith.mulf %102, %101 : vector<2x32xf32>
    %107 = arith.addf %105, %106 : vector<2x32xf32>
    %108 = math.tanh %107 : vector<2x32xf32>
    %109 = arith.mulf %104, %108 : vector<2x32xf32>
    %110 = vector.extract_strided_slice %7 {offsets = [0, 5, 0], sizes = [2, 1, 128], strides = [1, 1, 1]} : vector<2x8x128xf32> to vector<2x1x128xf32>
    %111 = vector.shape_cast %110 : vector<2x1x128xf32> to vector<2x128xf32>
    %c0_28 = arith.constant 0 : index
    %c0_29 = arith.constant 0 : index
    %112 = vector.load %arg3[%c0_28, %c0_29] : memref<32x128xf32, #tpu.memory_space<vmem>>, vector<32x128xf32>
    %cst_30 = arith.constant dense<0.000000e+00> : vector<2x128xf32>
    %113 = tpu.matmul %109, %112, %cst_30 {dimension_numbers = #tpu.dot_dimension_numbers<[1], [0], [0], [1], [0, 0, 1, 1], [], []>} : vector<2x32xf32>, vector<32x128xf32>, vector<2x128xf32> -> vector<2x128xf32>
    %114 = arith.addf %111, %113 : vector<2x128xf32>
    %115 = arith.negf %114 : vector<2x128xf32>
    %116 = math.exp %115 : vector<2x128xf32>
    %cst_31 = arith.constant 1.000000e+00 : f32
    %117 = vector.broadcast %cst_31 : f32 to vector<2x128xf32>
    %118 = arith.addf %117, %116 : vector<2x128xf32>
    %119 = arith.divf %117, %118 : vector<2x128xf32>
    %120 = vector.extract_strided_slice %114 {offsets = [0, 64], sizes = [2, 32], strides = [1, 1]} : vector<2x128xf32> to vector<2x32xf32>
    %121 = math.tanh %120 : vector<2x32xf32>
    %122 = vector.extract_strided_slice %119 {offsets = [0, 0], sizes = [2, 32], strides = [1, 1]} : vector<2x128xf32> to vector<2x32xf32>
    %123 = vector.extract_strided_slice %119 {offsets = [0, 32], sizes = [2, 32], strides = [1, 1]} : vector<2x128xf32> to vector<2x32xf32>
    %124 = vector.extract_strided_slice %119 {offsets = [0, 96], sizes = [2, 32], strides = [1, 1]} : vector<2x128xf32> to vector<2x32xf32>
    %125 = arith.mulf %123, %107 : vector<2x32xf32>
    %126 = arith.mulf %122, %121 : vector<2x32xf32>
    %127 = arith.addf %125, %126 : vector<2x32xf32>
    %128 = math.tanh %127 : vector<2x32xf32>
    %129 = arith.mulf %124, %128 : vector<2x32xf32>
    %130 = vector.extract_strided_slice %7 {offsets = [0, 6, 0], sizes = [2, 1, 128], strides = [1, 1, 1]} : vector<2x8x128xf32> to vector<2x1x128xf32>
    %131 = vector.shape_cast %130 : vector<2x1x128xf32> to vector<2x128xf32>
    %c0_32 = arith.constant 0 : index
    %c0_33 = arith.constant 0 : index
    %132 = vector.load %arg3[%c0_32, %c0_33] : memref<32x128xf32, #tpu.memory_space<vmem>>, vector<32x128xf32>
    %cst_34 = arith.constant dense<0.000000e+00> : vector<2x128xf32>
    %133 = tpu.matmul %129, %132, %cst_34 {dimension_numbers = #tpu.dot_dimension_numbers<[1], [0], [0], [1], [0, 0, 1, 1], [], []>} : vector<2x32xf32>, vector<32x128xf32>, vector<2x128xf32> -> vector<2x128xf32>
    %134 = arith.addf %131, %133 : vector<2x128xf32>
    %135 = arith.negf %134 : vector<2x128xf32>
    %136 = math.exp %135 : vector<2x128xf32>
    %cst_35 = arith.constant 1.000000e+00 : f32
    %137 = vector.broadcast %cst_35 : f32 to vector<2x128xf32>
    %138 = arith.addf %137, %136 : vector<2x128xf32>
    %139 = arith.divf %137, %138 : vector<2x128xf32>
    %140 = vector.extract_strided_slice %134 {offsets = [0, 64], sizes = [2, 32], strides = [1, 1]} : vector<2x128xf32> to vector<2x32xf32>
    %141 = math.tanh %140 : vector<2x32xf32>
    %142 = vector.extract_strided_slice %139 {offsets = [0, 0], sizes = [2, 32], strides = [1, 1]} : vector<2x128xf32> to vector<2x32xf32>
    %143 = vector.extract_strided_slice %139 {offsets = [0, 32], sizes = [2, 32], strides = [1, 1]} : vector<2x128xf32> to vector<2x32xf32>
    %144 = vector.extract_strided_slice %139 {offsets = [0, 96], sizes = [2, 32], strides = [1, 1]} : vector<2x128xf32> to vector<2x32xf32>
    %145 = arith.mulf %143, %127 : vector<2x32xf32>
    %146 = arith.mulf %142, %141 : vector<2x32xf32>
    %147 = arith.addf %145, %146 : vector<2x32xf32>
    %148 = math.tanh %147 : vector<2x32xf32>
    %149 = arith.mulf %144, %148 : vector<2x32xf32>
    %150 = vector.extract_strided_slice %7 {offsets = [0, 7, 0], sizes = [2, 1, 128], strides = [1, 1, 1]} : vector<2x8x128xf32> to vector<2x1x128xf32>
    %151 = vector.shape_cast %150 : vector<2x1x128xf32> to vector<2x128xf32>
    %c0_36 = arith.constant 0 : index
    %c0_37 = arith.constant 0 : index
    %152 = vector.load %arg3[%c0_36, %c0_37] : memref<32x128xf32, #tpu.memory_space<vmem>>, vector<32x128xf32>
    %cst_38 = arith.constant dense<0.000000e+00> : vector<2x128xf32>
    %153 = tpu.matmul %149, %152, %cst_38 {dimension_numbers = #tpu.dot_dimension_numbers<[1], [0], [0], [1], [0, 0, 1, 1], [], []>} : vector<2x32xf32>, vector<32x128xf32>, vector<2x128xf32> -> vector<2x128xf32>
    %154 = arith.addf %151, %153 : vector<2x128xf32>
    %155 = arith.negf %154 : vector<2x128xf32>
    %156 = math.exp %155 : vector<2x128xf32>
    %cst_39 = arith.constant 1.000000e+00 : f32
    %157 = vector.broadcast %cst_39 : f32 to vector<2x128xf32>
    %158 = arith.addf %157, %156 : vector<2x128xf32>
    %159 = arith.divf %157, %158 : vector<2x128xf32>
    %160 = vector.extract_strided_slice %154 {offsets = [0, 64], sizes = [2, 32], strides = [1, 1]} : vector<2x128xf32> to vector<2x32xf32>
    %161 = math.tanh %160 : vector<2x32xf32>
    %162 = vector.extract_strided_slice %159 {offsets = [0, 0], sizes = [2, 32], strides = [1, 1]} : vector<2x128xf32> to vector<2x32xf32>
    %163 = vector.extract_strided_slice %159 {offsets = [0, 32], sizes = [2, 32], strides = [1, 1]} : vector<2x128xf32> to vector<2x32xf32>
    %164 = vector.extract_strided_slice %159 {offsets = [0, 96], sizes = [2, 32], strides = [1, 1]} : vector<2x128xf32> to vector<2x32xf32>
    %165 = arith.mulf %163, %147 : vector<2x32xf32>
    %166 = arith.mulf %162, %161 : vector<2x32xf32>
    %167 = arith.addf %165, %166 : vector<2x32xf32>
    %168 = math.tanh %167 : vector<2x32xf32>
    %169 = arith.mulf %164, %168 : vector<2x32xf32>
    %170 = vector.shape_cast %29 : vector<2x32xf32> to vector<2x1x32xf32>
    %171 = vector.shape_cast %49 : vector<2x32xf32> to vector<2x1x32xf32>
    %172 = vector.shape_cast %69 : vector<2x32xf32> to vector<2x1x32xf32>
    %173 = vector.shape_cast %89 : vector<2x32xf32> to vector<2x1x32xf32>
    %174 = vector.shape_cast %109 : vector<2x32xf32> to vector<2x1x32xf32>
    %175 = vector.shape_cast %129 : vector<2x32xf32> to vector<2x1x32xf32>
    %176 = vector.shape_cast %149 : vector<2x32xf32> to vector<2x1x32xf32>
    %177 = vector.shape_cast %169 : vector<2x32xf32> to vector<2x1x32xf32>
    %178 = tpu.concatenate %170, %171, %172, %173, %174, %175, %176, %177 in 1 : vector<2x1x32xf32>, vector<2x1x32xf32>, vector<2x1x32xf32>, vector<2x1x32xf32>, vector<2x1x32xf32>, vector<2x1x32xf32>, vector<2x1x32xf32>, vector<2x1x32xf32> -> vector<2x8x32xf32>
    %179 = vector.shape_cast %178 : vector<2x8x32xf32> to vector<16x32xf32>
    %c0_40 = arith.constant 0 : index
    %c0_41 = arith.constant 0 : index
    %180 = vector.load %arg5[%c0_40, %c0_41] : memref<32x128xf32, #tpu.memory_space<vmem>>, vector<32x128xf32>
    %cst_42 = arith.constant dense<0.000000e+00> : vector<16x128xf32>
    %181 = tpu.matmul %179, %180, %cst_42 {dimension_numbers = #tpu.dot_dimension_numbers<[1], [0], [0], [1], [0, 0, 1, 1], [], []>} : vector<16x32xf32>, vector<32x128xf32>, vector<16x128xf32> -> vector<16x128xf32>
    %c0_43 = arith.constant 0 : index
    %c0_44 = arith.constant 0 : index
    %182 = vector.load %arg7[%c0_43, %c0_44] : memref<1x128xf32, #tpu.memory_space<vmem>>, vector<1x128xf32>
    %183 = vector.broadcast %182 : vector<1x128xf32> to vector<16x128xf32>
    %184 = arith.addf %181, %183 : vector<16x128xf32>
    %185 = vector.shape_cast %184 : vector<16x128xf32> to vector<2x8x128xf32>
    %cst_45 = arith.constant 0.000000e+00 : f32
    %186 = vector.broadcast %cst_45 : f32 to vector<2x32xf32>
    %cst_46 = arith.constant 0.000000e+00 : f32
    %187 = vector.broadcast %cst_46 : f32 to vector<2x32xf32>
    %188 = vector.extract_strided_slice %185 {offsets = [0, 0, 0], sizes = [2, 1, 128], strides = [1, 1, 1]} : vector<2x8x128xf32> to vector<2x1x128xf32>
    %189 = vector.shape_cast %188 : vector<2x1x128xf32> to vector<2x128xf32>
    %c0_47 = arith.constant 0 : index
    %c0_48 = arith.constant 0 : index
    %190 = vector.load %arg6[%c0_47, %c0_48] : memref<32x128xf32, #tpu.memory_space<vmem>>, vector<32x128xf32>
    %cst_49 = arith.constant dense<0.000000e+00> : vector<2x128xf32>
    %191 = tpu.matmul %186, %190, %cst_49 {dimension_numbers = #tpu.dot_dimension_numbers<[1], [0], [0], [1], [0, 0, 1, 1], [], []>} : vector<2x32xf32>, vector<32x128xf32>, vector<2x128xf32> -> vector<2x128xf32>
    %192 = arith.addf %189, %191 : vector<2x128xf32>
    %193 = arith.negf %192 : vector<2x128xf32>
    %194 = math.exp %193 : vector<2x128xf32>
    %cst_50 = arith.constant 1.000000e+00 : f32
    %195 = vector.broadcast %cst_50 : f32 to vector<2x128xf32>
    %196 = arith.addf %195, %194 : vector<2x128xf32>
    %197 = arith.divf %195, %196 : vector<2x128xf32>
    %198 = vector.extract_strided_slice %192 {offsets = [0, 64], sizes = [2, 32], strides = [1, 1]} : vector<2x128xf32> to vector<2x32xf32>
    %199 = math.tanh %198 : vector<2x32xf32>
    %200 = vector.extract_strided_slice %197 {offsets = [0, 0], sizes = [2, 32], strides = [1, 1]} : vector<2x128xf32> to vector<2x32xf32>
    %201 = vector.extract_strided_slice %197 {offsets = [0, 32], sizes = [2, 32], strides = [1, 1]} : vector<2x128xf32> to vector<2x32xf32>
    %202 = vector.extract_strided_slice %197 {offsets = [0, 96], sizes = [2, 32], strides = [1, 1]} : vector<2x128xf32> to vector<2x32xf32>
    %203 = arith.mulf %201, %187 : vector<2x32xf32>
    %204 = arith.mulf %200, %199 : vector<2x32xf32>
    %205 = arith.addf %203, %204 : vector<2x32xf32>
    %206 = math.tanh %205 : vector<2x32xf32>
    %207 = arith.mulf %202, %206 : vector<2x32xf32>
    %208 = vector.extract_strided_slice %185 {offsets = [0, 1, 0], sizes = [2, 1, 128], strides = [1, 1, 1]} : vector<2x8x128xf32> to vector<2x1x128xf32>
    %209 = vector.shape_cast %208 : vector<2x1x128xf32> to vector<2x128xf32>
    %c0_51 = arith.constant 0 : index
    %c0_52 = arith.constant 0 : index
    %210 = vector.load %arg6[%c0_51, %c0_52] : memref<32x128xf32, #tpu.memory_space<vmem>>, vector<32x128xf32>
    %cst_53 = arith.constant dense<0.000000e+00> : vector<2x128xf32>
    %211 = tpu.matmul %207, %210, %cst_53 {dimension_numbers = #tpu.dot_dimension_numbers<[1], [0], [0], [1], [0, 0, 1, 1], [], []>} : vector<2x32xf32>, vector<32x128xf32>, vector<2x128xf32> -> vector<2x128xf32>
    %212 = arith.addf %209, %211 : vector<2x128xf32>
    %213 = arith.negf %212 : vector<2x128xf32>
    %214 = math.exp %213 : vector<2x128xf32>
    %cst_54 = arith.constant 1.000000e+00 : f32
    %215 = vector.broadcast %cst_54 : f32 to vector<2x128xf32>
    %216 = arith.addf %215, %214 : vector<2x128xf32>
    %217 = arith.divf %215, %216 : vector<2x128xf32>
    %218 = vector.extract_strided_slice %212 {offsets = [0, 64], sizes = [2, 32], strides = [1, 1]} : vector<2x128xf32> to vector<2x32xf32>
    %219 = math.tanh %218 : vector<2x32xf32>
    %220 = vector.extract_strided_slice %217 {offsets = [0, 0], sizes = [2, 32], strides = [1, 1]} : vector<2x128xf32> to vector<2x32xf32>
    %221 = vector.extract_strided_slice %217 {offsets = [0, 32], sizes = [2, 32], strides = [1, 1]} : vector<2x128xf32> to vector<2x32xf32>
    %222 = vector.extract_strided_slice %217 {offsets = [0, 96], sizes = [2, 32], strides = [1, 1]} : vector<2x128xf32> to vector<2x32xf32>
    %223 = arith.mulf %221, %205 : vector<2x32xf32>
    %224 = arith.mulf %220, %219 : vector<2x32xf32>
    %225 = arith.addf %223, %224 : vector<2x32xf32>
    %226 = math.tanh %225 : vector<2x32xf32>
    %227 = arith.mulf %222, %226 : vector<2x32xf32>
    %228 = vector.extract_strided_slice %185 {offsets = [0, 2, 0], sizes = [2, 1, 128], strides = [1, 1, 1]} : vector<2x8x128xf32> to vector<2x1x128xf32>
    %229 = vector.shape_cast %228 : vector<2x1x128xf32> to vector<2x128xf32>
    %c0_55 = arith.constant 0 : index
    %c0_56 = arith.constant 0 : index
    %230 = vector.load %arg6[%c0_55, %c0_56] : memref<32x128xf32, #tpu.memory_space<vmem>>, vector<32x128xf32>
    %cst_57 = arith.constant dense<0.000000e+00> : vector<2x128xf32>
    %231 = tpu.matmul %227, %230, %cst_57 {dimension_numbers = #tpu.dot_dimension_numbers<[1], [0], [0], [1], [0, 0, 1, 1], [], []>} : vector<2x32xf32>, vector<32x128xf32>, vector<2x128xf32> -> vector<2x128xf32>
    %232 = arith.addf %229, %231 : vector<2x128xf32>
    %233 = arith.negf %232 : vector<2x128xf32>
    %234 = math.exp %233 : vector<2x128xf32>
    %cst_58 = arith.constant 1.000000e+00 : f32
    %235 = vector.broadcast %cst_58 : f32 to vector<2x128xf32>
    %236 = arith.addf %235, %234 : vector<2x128xf32>
    %237 = arith.divf %235, %236 : vector<2x128xf32>
    %238 = vector.extract_strided_slice %232 {offsets = [0, 64], sizes = [2, 32], strides = [1, 1]} : vector<2x128xf32> to vector<2x32xf32>
    %239 = math.tanh %238 : vector<2x32xf32>
    %240 = vector.extract_strided_slice %237 {offsets = [0, 0], sizes = [2, 32], strides = [1, 1]} : vector<2x128xf32> to vector<2x32xf32>
    %241 = vector.extract_strided_slice %237 {offsets = [0, 32], sizes = [2, 32], strides = [1, 1]} : vector<2x128xf32> to vector<2x32xf32>
    %242 = vector.extract_strided_slice %237 {offsets = [0, 96], sizes = [2, 32], strides = [1, 1]} : vector<2x128xf32> to vector<2x32xf32>
    %243 = arith.mulf %241, %225 : vector<2x32xf32>
    %244 = arith.mulf %240, %239 : vector<2x32xf32>
    %245 = arith.addf %243, %244 : vector<2x32xf32>
    %246 = math.tanh %245 : vector<2x32xf32>
    %247 = arith.mulf %242, %246 : vector<2x32xf32>
    %248 = vector.extract_strided_slice %185 {offsets = [0, 3, 0], sizes = [2, 1, 128], strides = [1, 1, 1]} : vector<2x8x128xf32> to vector<2x1x128xf32>
    %249 = vector.shape_cast %248 : vector<2x1x128xf32> to vector<2x128xf32>
    %c0_59 = arith.constant 0 : index
    %c0_60 = arith.constant 0 : index
    %250 = vector.load %arg6[%c0_59, %c0_60] : memref<32x128xf32, #tpu.memory_space<vmem>>, vector<32x128xf32>
    %cst_61 = arith.constant dense<0.000000e+00> : vector<2x128xf32>
    %251 = tpu.matmul %247, %250, %cst_61 {dimension_numbers = #tpu.dot_dimension_numbers<[1], [0], [0], [1], [0, 0, 1, 1], [], []>} : vector<2x32xf32>, vector<32x128xf32>, vector<2x128xf32> -> vector<2x128xf32>
    %252 = arith.addf %249, %251 : vector<2x128xf32>
    %253 = arith.negf %252 : vector<2x128xf32>
    %254 = math.exp %253 : vector<2x128xf32>
    %cst_62 = arith.constant 1.000000e+00 : f32
    %255 = vector.broadcast %cst_62 : f32 to vector<2x128xf32>
    %256 = arith.addf %255, %254 : vector<2x128xf32>
    %257 = arith.divf %255, %256 : vector<2x128xf32>
    %258 = vector.extract_strided_slice %252 {offsets = [0, 64], sizes = [2, 32], strides = [1, 1]} : vector<2x128xf32> to vector<2x32xf32>
    %259 = math.tanh %258 : vector<2x32xf32>
    %260 = vector.extract_strided_slice %257 {offsets = [0, 0], sizes = [2, 32], strides = [1, 1]} : vector<2x128xf32> to vector<2x32xf32>
    %261 = vector.extract_strided_slice %257 {offsets = [0, 32], sizes = [2, 32], strides = [1, 1]} : vector<2x128xf32> to vector<2x32xf32>
    %262 = vector.extract_strided_slice %257 {offsets = [0, 96], sizes = [2, 32], strides = [1, 1]} : vector<2x128xf32> to vector<2x32xf32>
    %263 = arith.mulf %261, %245 : vector<2x32xf32>
    %264 = arith.mulf %260, %259 : vector<2x32xf32>
    %265 = arith.addf %263, %264 : vector<2x32xf32>
    %266 = math.tanh %265 : vector<2x32xf32>
    %267 = arith.mulf %262, %266 : vector<2x32xf32>
    %268 = vector.extract_strided_slice %185 {offsets = [0, 4, 0], sizes = [2, 1, 128], strides = [1, 1, 1]} : vector<2x8x128xf32> to vector<2x1x128xf32>
    %269 = vector.shape_cast %268 : vector<2x1x128xf32> to vector<2x128xf32>
    %c0_63 = arith.constant 0 : index
    %c0_64 = arith.constant 0 : index
    %270 = vector.load %arg6[%c0_63, %c0_64] : memref<32x128xf32, #tpu.memory_space<vmem>>, vector<32x128xf32>
    %cst_65 = arith.constant dense<0.000000e+00> : vector<2x128xf32>
    %271 = tpu.matmul %267, %270, %cst_65 {dimension_numbers = #tpu.dot_dimension_numbers<[1], [0], [0], [1], [0, 0, 1, 1], [], []>} : vector<2x32xf32>, vector<32x128xf32>, vector<2x128xf32> -> vector<2x128xf32>
    %272 = arith.addf %269, %271 : vector<2x128xf32>
    %273 = arith.negf %272 : vector<2x128xf32>
    %274 = math.exp %273 : vector<2x128xf32>
    %cst_66 = arith.constant 1.000000e+00 : f32
    %275 = vector.broadcast %cst_66 : f32 to vector<2x128xf32>
    %276 = arith.addf %275, %274 : vector<2x128xf32>
    %277 = arith.divf %275, %276 : vector<2x128xf32>
    %278 = vector.extract_strided_slice %272 {offsets = [0, 64], sizes = [2, 32], strides = [1, 1]} : vector<2x128xf32> to vector<2x32xf32>
    %279 = math.tanh %278 : vector<2x32xf32>
    %280 = vector.extract_strided_slice %277 {offsets = [0, 0], sizes = [2, 32], strides = [1, 1]} : vector<2x128xf32> to vector<2x32xf32>
    %281 = vector.extract_strided_slice %277 {offsets = [0, 32], sizes = [2, 32], strides = [1, 1]} : vector<2x128xf32> to vector<2x32xf32>
    %282 = vector.extract_strided_slice %277 {offsets = [0, 96], sizes = [2, 32], strides = [1, 1]} : vector<2x128xf32> to vector<2x32xf32>
    %283 = arith.mulf %281, %265 : vector<2x32xf32>
    %284 = arith.mulf %280, %279 : vector<2x32xf32>
    %285 = arith.addf %283, %284 : vector<2x32xf32>
    %286 = math.tanh %285 : vector<2x32xf32>
    %287 = arith.mulf %282, %286 : vector<2x32xf32>
    %288 = vector.extract_strided_slice %185 {offsets = [0, 5, 0], sizes = [2, 1, 128], strides = [1, 1, 1]} : vector<2x8x128xf32> to vector<2x1x128xf32>
    %289 = vector.shape_cast %288 : vector<2x1x128xf32> to vector<2x128xf32>
    %c0_67 = arith.constant 0 : index
    %c0_68 = arith.constant 0 : index
    %290 = vector.load %arg6[%c0_67, %c0_68] : memref<32x128xf32, #tpu.memory_space<vmem>>, vector<32x128xf32>
    %cst_69 = arith.constant dense<0.000000e+00> : vector<2x128xf32>
    %291 = tpu.matmul %287, %290, %cst_69 {dimension_numbers = #tpu.dot_dimension_numbers<[1], [0], [0], [1], [0, 0, 1, 1], [], []>} : vector<2x32xf32>, vector<32x128xf32>, vector<2x128xf32> -> vector<2x128xf32>
    %292 = arith.addf %289, %291 : vector<2x128xf32>
    %293 = arith.negf %292 : vector<2x128xf32>
    %294 = math.exp %293 : vector<2x128xf32>
    %cst_70 = arith.constant 1.000000e+00 : f32
    %295 = vector.broadcast %cst_70 : f32 to vector<2x128xf32>
    %296 = arith.addf %295, %294 : vector<2x128xf32>
    %297 = arith.divf %295, %296 : vector<2x128xf32>
    %298 = vector.extract_strided_slice %292 {offsets = [0, 64], sizes = [2, 32], strides = [1, 1]} : vector<2x128xf32> to vector<2x32xf32>
    %299 = math.tanh %298 : vector<2x32xf32>
    %300 = vector.extract_strided_slice %297 {offsets = [0, 0], sizes = [2, 32], strides = [1, 1]} : vector<2x128xf32> to vector<2x32xf32>
    %301 = vector.extract_strided_slice %297 {offsets = [0, 32], sizes = [2, 32], strides = [1, 1]} : vector<2x128xf32> to vector<2x32xf32>
    %302 = vector.extract_strided_slice %297 {offsets = [0, 96], sizes = [2, 32], strides = [1, 1]} : vector<2x128xf32> to vector<2x32xf32>
    %303 = arith.mulf %301, %285 : vector<2x32xf32>
    %304 = arith.mulf %300, %299 : vector<2x32xf32>
    %305 = arith.addf %303, %304 : vector<2x32xf32>
    %306 = math.tanh %305 : vector<2x32xf32>
    %307 = arith.mulf %302, %306 : vector<2x32xf32>
    %308 = vector.extract_strided_slice %185 {offsets = [0, 6, 0], sizes = [2, 1, 128], strides = [1, 1, 1]} : vector<2x8x128xf32> to vector<2x1x128xf32>
    %309 = vector.shape_cast %308 : vector<2x1x128xf32> to vector<2x128xf32>
    %c0_71 = arith.constant 0 : index
    %c0_72 = arith.constant 0 : index
    %310 = vector.load %arg6[%c0_71, %c0_72] : memref<32x128xf32, #tpu.memory_space<vmem>>, vector<32x128xf32>
    %cst_73 = arith.constant dense<0.000000e+00> : vector<2x128xf32>
    %311 = tpu.matmul %307, %310, %cst_73 {dimension_numbers = #tpu.dot_dimension_numbers<[1], [0], [0], [1], [0, 0, 1, 1], [], []>} : vector<2x32xf32>, vector<32x128xf32>, vector<2x128xf32> -> vector<2x128xf32>
    %312 = arith.addf %309, %311 : vector<2x128xf32>
    %313 = arith.negf %312 : vector<2x128xf32>
    %314 = math.exp %313 : vector<2x128xf32>
    %cst_74 = arith.constant 1.000000e+00 : f32
    %315 = vector.broadcast %cst_74 : f32 to vector<2x128xf32>
    %316 = arith.addf %315, %314 : vector<2x128xf32>
    %317 = arith.divf %315, %316 : vector<2x128xf32>
    %318 = vector.extract_strided_slice %312 {offsets = [0, 64], sizes = [2, 32], strides = [1, 1]} : vector<2x128xf32> to vector<2x32xf32>
    %319 = math.tanh %318 : vector<2x32xf32>
    %320 = vector.extract_strided_slice %317 {offsets = [0, 0], sizes = [2, 32], strides = [1, 1]} : vector<2x128xf32> to vector<2x32xf32>
    %321 = vector.extract_strided_slice %317 {offsets = [0, 32], sizes = [2, 32], strides = [1, 1]} : vector<2x128xf32> to vector<2x32xf32>
    %322 = vector.extract_strided_slice %317 {offsets = [0, 96], sizes = [2, 32], strides = [1, 1]} : vector<2x128xf32> to vector<2x32xf32>
    %323 = arith.mulf %321, %305 : vector<2x32xf32>
    %324 = arith.mulf %320, %319 : vector<2x32xf32>
    %325 = arith.addf %323, %324 : vector<2x32xf32>
    %326 = math.tanh %325 : vector<2x32xf32>
    %327 = arith.mulf %322, %326 : vector<2x32xf32>
    %328 = vector.extract_strided_slice %185 {offsets = [0, 7, 0], sizes = [2, 1, 128], strides = [1, 1, 1]} : vector<2x8x128xf32> to vector<2x1x128xf32>
    %329 = vector.shape_cast %328 : vector<2x1x128xf32> to vector<2x128xf32>
    %c0_75 = arith.constant 0 : index
    %c0_76 = arith.constant 0 : index
    %330 = vector.load %arg6[%c0_75, %c0_76] : memref<32x128xf32, #tpu.memory_space<vmem>>, vector<32x128xf32>
    %cst_77 = arith.constant dense<0.000000e+00> : vector<2x128xf32>
    %331 = tpu.matmul %327, %330, %cst_77 {dimension_numbers = #tpu.dot_dimension_numbers<[1], [0], [0], [1], [0, 0, 1, 1], [], []>} : vector<2x32xf32>, vector<32x128xf32>, vector<2x128xf32> -> vector<2x128xf32>
    %332 = arith.addf %329, %331 : vector<2x128xf32>
    %333 = arith.negf %332 : vector<2x128xf32>
    %334 = math.exp %333 : vector<2x128xf32>
    %cst_78 = arith.constant 1.000000e+00 : f32
    %335 = vector.broadcast %cst_78 : f32 to vector<2x128xf32>
    %336 = arith.addf %335, %334 : vector<2x128xf32>
    %337 = arith.divf %335, %336 : vector<2x128xf32>
    %338 = vector.extract_strided_slice %332 {offsets = [0, 64], sizes = [2, 32], strides = [1, 1]} : vector<2x128xf32> to vector<2x32xf32>
    %339 = math.tanh %338 : vector<2x32xf32>
    %340 = vector.extract_strided_slice %337 {offsets = [0, 0], sizes = [2, 32], strides = [1, 1]} : vector<2x128xf32> to vector<2x32xf32>
    %341 = vector.extract_strided_slice %337 {offsets = [0, 32], sizes = [2, 32], strides = [1, 1]} : vector<2x128xf32> to vector<2x32xf32>
    %342 = vector.extract_strided_slice %337 {offsets = [0, 96], sizes = [2, 32], strides = [1, 1]} : vector<2x128xf32> to vector<2x32xf32>
    %343 = arith.mulf %341, %325 : vector<2x32xf32>
    %344 = arith.mulf %340, %339 : vector<2x32xf32>
    %345 = arith.addf %343, %344 : vector<2x32xf32>
    %346 = math.tanh %345 : vector<2x32xf32>
    %347 = arith.mulf %342, %346 : vector<2x32xf32>
    %cst_79 = arith.constant 0.176776692 : f32
    %348 = vector.broadcast %cst_79 : f32 to vector<2x32xf32>
    %349 = arith.mulf %169, %348 : vector<2x32xf32>
    %cst_80 = arith.constant 0.176776692 : f32
    %350 = vector.broadcast %cst_80 : f32 to vector<2x32xf32>
    %351 = arith.mulf %347, %350 : vector<2x32xf32>
    %352 = arith.mulf %349, %169 : vector<2x32xf32>
    %cst_81 = arith.constant dense<0.000000e+00> : vector<2xf32>
    %353 = vector.multi_reduction <add>, %352, %cst_81 [1] : vector<2x32xf32> to vector<2xf32>
    %354 = vector.shape_cast %353 : vector<2xf32> to vector<2x1xf32>
    %355 = arith.mulf %349, %347 : vector<2x32xf32>
    %cst_82 = arith.constant dense<0.000000e+00> : vector<2xf32>
    %356 = vector.multi_reduction <add>, %355, %cst_82 [1] : vector<2x32xf32> to vector<2xf32>
    %357 = vector.shape_cast %356 : vector<2xf32> to vector<2x1xf32>
    %358 = arith.mulf %351, %169 : vector<2x32xf32>
    %cst_83 = arith.constant dense<0.000000e+00> : vector<2xf32>
    %359 = vector.multi_reduction <add>, %358, %cst_83 [1] : vector<2x32xf32> to vector<2xf32>
    %360 = vector.shape_cast %359 : vector<2xf32> to vector<2x1xf32>
    %361 = arith.mulf %351, %347 : vector<2x32xf32>
    %cst_84 = arith.constant dense<0.000000e+00> : vector<2xf32>
    %362 = vector.multi_reduction <add>, %361, %cst_84 [1] : vector<2x32xf32> to vector<2xf32>
    %363 = vector.shape_cast %362 : vector<2xf32> to vector<2x1xf32>
    %cst_85 = arith.constant 0.000000e+00 : f32
    %364 = vector.broadcast %cst_85 : f32 to vector<2x1xf32>
    %cst_86 = arith.constant 0.000000e+00 : f32
    %365 = vector.broadcast %cst_86 : f32 to vector<2x1xf32>
    %366 = arith.maximumf %354, %357 : vector<2x1xf32>
    %367 = arith.subf %354, %366 : vector<2x1xf32>
    %368 = math.exp %367 : vector<2x1xf32>
    %369 = arith.subf %357, %366 : vector<2x1xf32>
    %370 = math.exp %369 : vector<2x1xf32>
    %371 = arith.addf %368, %370 : vector<2x1xf32>
    %372 = tpu.reciprocal %371 {approx = true} : vector<2x1xf32> -> vector<2x1xf32>
    %373 = arith.mulf %371, %372 : vector<2x1xf32>
    %cst_87 = arith.constant 2.000000e+00 : f32
    %374 = vector.broadcast %cst_87 : f32 to vector<2x1xf32>
    %375 = arith.subf %374, %373 : vector<2x1xf32>
    %376 = arith.mulf %372, %375 : vector<2x1xf32>
    %377 = arith.mulf %368, %376 : vector<2x1xf32>
    %378 = arith.addf %364, %377 : vector<2x1xf32>
    %379 = arith.mulf %370, %376 : vector<2x1xf32>
    %380 = arith.addf %365, %379 : vector<2x1xf32>
    %381 = arith.maximumf %360, %363 : vector<2x1xf32>
    %382 = arith.subf %360, %381 : vector<2x1xf32>
    %383 = math.exp %382 : vector<2x1xf32>
    %384 = arith.subf %363, %381 : vector<2x1xf32>
    %385 = math.exp %384 : vector<2x1xf32>
    %386 = arith.addf %383, %385 : vector<2x1xf32>
    %387 = tpu.reciprocal %386 {approx = true} : vector<2x1xf32> -> vector<2x1xf32>
    %388 = arith.mulf %386, %387 : vector<2x1xf32>
    %cst_88 = arith.constant 2.000000e+00 : f32
    %389 = vector.broadcast %cst_88 : f32 to vector<2x1xf32>
    %390 = arith.subf %389, %388 : vector<2x1xf32>
    %391 = arith.mulf %387, %390 : vector<2x1xf32>
    %392 = arith.mulf %383, %391 : vector<2x1xf32>
    %393 = arith.addf %378, %392 : vector<2x1xf32>
    %394 = arith.mulf %385, %391 : vector<2x1xf32>
    %395 = arith.addf %380, %394 : vector<2x1xf32>
    %396 = vector.broadcast %393 : vector<2x1xf32> to vector<2x32xf32>
    %397 = arith.mulf %396, %169 : vector<2x32xf32>
    %398 = vector.broadcast %395 : vector<2x1xf32> to vector<2x32xf32>
    %399 = arith.mulf %398, %347 : vector<2x32xf32>
    %400 = arith.addf %397, %399 : vector<2x32xf32>
    %c0_89 = arith.constant 0 : index
    %c0_90 = arith.constant 0 : index
    %401 = vector.load %arg8[%c0_89, %c0_90] : memref<32x4xf32, #tpu.memory_space<vmem>>, vector<32x4xf32>
    %cst_91 = arith.constant dense<0.000000e+00> : vector<2x4xf32>
    %402 = tpu.matmul %400, %401, %cst_91 {dimension_numbers = #tpu.dot_dimension_numbers<[1], [0], [0], [1], [0, 0, 1, 1], [], []>} : vector<2x32xf32>, vector<32x4xf32>, vector<2x4xf32> -> vector<2x4xf32>
    %c0_92 = arith.constant 0 : index
    %c0_93 = arith.constant 0 : index
    %403 = vector.load %arg9[%c0_92, %c0_93] : memref<1x4xf32, #tpu.memory_space<vmem>>, vector<1x4xf32>
    %404 = vector.broadcast %403 : vector<1x4xf32> to vector<2x4xf32>
    %405 = arith.addf %402, %404 : vector<2x4xf32>
    %c0_94 = arith.constant 0 : index
    %c0_95 = arith.constant 0 : index
    %406 = vector.load %arg10[%c0_94, %c0_95] : memref<2x4xf32, #tpu.memory_space<vmem>>, vector<2x4xf32>
    tpu.vector_store %arg10[%c0_94, %c0_95], %405 {strides = array<i32>} : memref<2x4xf32, #tpu.memory_space<vmem>>, vector<2x4xf32>,
    return
  }
  func.func @transform_0(%arg0: i32) -> (i32, i32, i32) {
    %c0_i32 = arith.constant 0 : i32
    %c0_i32_0 = arith.constant 0 : i32
    %c0_i32_1 = arith.constant 0 : i32
    %c0_i32_2 = arith.constant 0 : i32
    return %c0_i32, %c0_i32_0, %c0_i32_1 : i32, i32, i32
  }
  func.func @transform_1(%arg0: i32) -> (i32, i32) {
    %c0_i32 = arith.constant 0 : i32
    %c0_i32_0 = arith.constant 0 : i32
    %c0_i32_1 = arith.constant 0 : i32
    return %c0_i32, %c0_i32_0 : i32, i32
  }
  func.func @transform_2(%arg0: i32) -> (i32, i32) {
    %c0_i32 = arith.constant 0 : i32
    %c0_i32_0 = arith.constant 0 : i32
    %c0_i32_1 = arith.constant 0 : i32
    return %c0_i32, %c0_i32_0 : i32, i32
  }
  func.func @transform_3(%arg0: i32) -> (i32, i32) {
    %c0_i32 = arith.constant 0 : i32
    %c0_i32_0 = arith.constant 0 : i32
    %c0_i32_1 = arith.constant 0 : i32
    return %c0_i32, %c0_i32_0 : i32, i32
  }
  func.func @transform_4(%arg0: i32) -> (i32, i32) {
    %c0_i32 = arith.constant 0 : i32
    %c0_i32_0 = arith.constant 0 : i32
    %c0_i32_1 = arith.constant 0 : i32
    return %c0_i32, %c0_i32_0 : i32, i32
  }
  func.func @transform_5(%arg0: i32) -> (i32, i32) {
    %c0_i32 = arith.constant 0 : i32
    %c0_i32_0 = arith.constant 0 : i32
    %c0_i32_1 = arith.constant 0 : i32
    return %c0_i32, %c0_i32_0 : i32, i32
  }
  func.func @transform_6(%arg0: i32) -> (i32, i32) {
    %c0_i32 = arith.constant 0 : i32
    %c0_i32_0 = arith.constant 0 : i32
    %c0_i32_1 = arith.constant 0 : i32
    return %c0_i32, %c0_i32_0 : i32, i32
  }
  func.func @transform_7(%arg0: i32) -> (i32, i32) {
    %c0_i32 = arith.constant 0 : i32
    %c0_i32_0 = arith.constant 0 : i32
    %c0_i32_1 = arith.constant 0 : i32
    return %c0_i32, %c0_i32_0 : i32, i32
  }
  func.func @transform_8(%arg0: i32) -> (i32, i32) {
    %c0_i32 = arith.constant 0 : i32
    %c0_i32_0 = arith.constant 0 : i32
    %c0_i32_1 = arith.constant 0 : i32
    return %c0_i32, %c0_i32_0 : i32, i32
  }
  func.func @transform_9(%arg0: i32) -> (i32, i32) {
    %c0_i32 = arith.constant 0 : i32
    %c0_i32_0 = arith.constant 0 : i32
    %c0_i32_1 = arith.constant 0 : i32
    return %c0_i32, %c0_i32_0 : i32, i32
  }
}

</mosaic_0001>

<bundles_post_ra>
// kernel: lstm_attention_forward.1
= control target key start
LH: loop header
LB: loop body
LE: loop exit
PB: predicated region body
PF: predicated region fallthrough
CT: control target
= control target key end

     0   :  { %14 = vsyncpa [#allocation3], 0  ;;  %s4179_s0 = inlined_call_operand.hbm [shape: f32[2,8,8], index: 0, kind: input, shape index: {}]   ;;  %s4180_s1 = inlined_call_operand.hbm [shape: f32[8,128], index: 1, kind: input, shape index: {}]   ;;  %s4181_s2 = inlined_call_operand.vmem [shape: f32[32,128], index: 2, kind: input, shape index: {}]   ;;  %s4182_s3 = inlined_call_operand.vmem [shape: f32[1,128], index: 3, kind: input, shape index: {}]   ;;  %s4183_s4 = inlined_call_operand.vmem [shape: f32[32,128], index: 4, kind: input, shape index: {}]   ;;  %s4184_s5 = inlined_call_operand.hbm [shape: f32[32,128], index: 5, kind: input, shape index: {}]   ;;  %s4185_s6 = inlined_call_operand.vmem [shape: f32[1,128], index: 6, kind: input, shape index: {}]   ;;  %s4186_s7 = inlined_call_operand.vmem [shape: f32[32,4], index: 7, kind: input, shape index: {}]   ;;  %s4187_s8 = inlined_call_operand.hbm [shape: f32[1,4], index: 8, kind: input, shape index: {}]   ;;  %s4188_s9 = inlined_call_operand.hbm [shape: f32[2,4], index: 9, kind: output, shape index: {}]  }
   0x1   :  { %15 = vsyncpa [#allocation6], 0 }
   0x2   :  { %16 = vsyncpa [#allocation9], 0 }
   0x3   :  { %17 = vsyncpa [#allocation4], 0  ;;  %s3648_s30 = smov [#allocation5]   ;;  %s3649_s11 = smov [#allocation2]  }
   0x4   :  { %s36_s10 = sshll.u32 %s3648_s30, 4  ;;  %s23_s12 = sshll.u32 %s3649_s11, 4  ;;  %s37_s10 = int_to_ptr.vmem [resolvable:$true] %s36_s10  ;;  %s3710_s12 = int_to_ptr.vmem [resolvable:$true] %s23_s12 }
   0x5   :  { %s3530_s15 = scalar_lea.hbm %s4180_s1, 128 }
   0x6   :  { %p3531_p0 = scmp.ne.s32.totalorder %s4180_s1, %s3530_s15  ;;  %p3534_p1 = scmp.lt.u32.totalorder %s3530_s15, %s4180_s1 }
   0x8   :  { %p3536_p2 = pnand %p3534_p1, %p3531_p0 }
   0xa   :  { %3539 = shalt.err (!%p3536_p2)
}
   0xb   :  { %s3540_s20 = scalar_lea.vmem %s37_s10, 128  ;;  %p3545_p4 = scmp.lt.s32.totalorder %s37_s10, %s37_s10 }
   0xc   :  { %p3541_p3 = scmp.ne.s32.totalorder %s37_s10, %s3540_s20  ;;  %p3546_p5 = scmp.lt.s32.totalorder %s3540_s20, %s3540_s20 }
   0xe   :  { %p3547_p6 = por %p3546_p5, %p3545_p4 }
  0x10   :  { %p3548_p7 = pnand %p3547_p6, %p3541_p3 }
  0x12   :  { %3551 = shalt.err (!%p3548_p7)
}
  0x13   :  { %39 = dma.hbm_to_vmem [thread:$0]  %s4180_s1, 128, %s37_s10, [#allocation6]  }
  0x14   :  { %s3552_s25 = scalar_lea.hbm %s4179_s0, 256 }
  0x15   :  { %p3553_p8 = scmp.ne.s32.totalorder %s4179_s0, %s3552_s25  ;;  %p3556_p9 = scmp.lt.u32.totalorder %s3552_s25, %s4179_s0 }
  0x17   :  { %p3558_p10 = pnand %p3556_p9, %p3553_p8 }
  0x19   :  { %3561 = shalt.err (!%p3558_p10)
}
  0x1a   :  { %s3562_s30 = scalar_lea.vmem %s3710_s12, 256  ;;  %p3567_p12 = scmp.lt.s32.totalorder %s3710_s12, %s3710_s12 }
  0x1b   :  { %p3563_p11 = scmp.ne.s32.totalorder %s3710_s12, %s3562_s30  ;;  %p3568_p13 = scmp.lt.s32.totalorder %s3562_s30, %s3562_s30 }
  0x1d   :  { %p3569_p0 = por %p3568_p13, %p3567_p12 }
  0x1f   :  { %p3570_p1 = pnand %p3569_p0, %p3563_p11 }
  0x21   :  { %3573 = shalt.err (!%p3570_p1)
}
  0x22   :  { %s3650_s1 = smov 128   ;;  %s3651_s10 = smov 8  }
  0x23   :  { %29 = dma.hbm_to_vmem [thread:$0]  %s4179_s0, 256, %s3710_s12, [#allocation3], %s3650_s1, %s3650_s1, %s3651_s10  }
  0x24   :  { %s3652_s14 = smov [#allocation7]   ;;  %s3653_s16 = smov [#allocation8]  }
  0x25   :  { %s51_s15 = sshll.u32 %s3652_s14, 4  ;;  %s68_s17 = sshll.u32 %s3653_s16, 4  ;;  %s52_s15 = int_to_ptr.vmem [resolvable:$true] %s51_s15  ;;  %s69_s17 = int_to_ptr.vmem [resolvable:$true] %s68_s17 }
  0x26   :  { %s3574_s20 = scalar_lea.hbm %s4184_s5, 512 }
  0x27   :  { %p3575_p2 = scmp.ne.s32.totalorder %s4184_s5, %s3574_s20  ;;  %p3578_p3 = scmp.lt.u32.totalorder %s3574_s20, %s4184_s5 }
  0x29   :  { %p3580_p4 = pnand %p3578_p3, %p3575_p2 }
  0x2b   :  { %3583 = shalt.err (!%p3580_p4)
}
  0x2c   :  { %s3584_s0 = scalar_lea.vmem %s52_s15, 512  ;;  %p3589_p6 = scmp.lt.s32.totalorder %s52_s15, %s52_s15 }
  0x2d   :  { %p3585_p5 = scmp.ne.s32.totalorder %s52_s15, %s3584_s0  ;;  %p3590_p7 = scmp.lt.s32.totalorder %s3584_s0, %s3584_s0 }
  0x2f   :  { %p3591_p8 = por %p3590_p7, %p3589_p6 }
  0x31   :  { %p3592_p9 = pnand %p3591_p8, %p3585_p5 }
  0x33   :  { %3595 = shalt.err (!%p3592_p9)
}
  0x34   :  { %57 = dma.hbm_to_vmem [thread:$0]  %s4184_s5, 512, %s52_s15, [#allocation6], %s3650_s1, %s3650_s1, %s3651_s10  }
  0x35   :  { %s3596_s28 = scalar_lea.hbm %s4187_s8, 16 }
  0x36   :  { %p3597_p10 = scmp.ne.s32.totalorder %s4187_s8, %s3596_s28  ;;  %p3600_p11 = scmp.lt.u32.totalorder %s3596_s28, %s4187_s8 }
  0x38   :  { %p3602_p12 = pnand %p3600_p11, %p3597_p10 }
  0x3a   :  { %3605 = shalt.err (!%p3602_p12)
}
  0x3b   :  { %s3606_s14 = scalar_lea.vmem %s69_s17, 16  ;;  %s3610_s16 = scalar_lea.vmem %s69_s17, 32 }
  0x3c   :  { %p3607_p13 = scmp.ne.s32.totalorder %s69_s17, %s3606_s14  ;;  %p3611_p0 = scmp.lt.s32.totalorder %s69_s17, %s69_s17 }
  0x3d   :  { %p3612_p1 = scmp.lt.s32.totalorder %s3610_s16, %s3606_s14 }
  0x3f   :  { %p3613_p2 = por %p3612_p1, %p3611_p0 }
  0x41   :  { %p3614_p3 = pnand %p3613_p2, %p3607_p13 }
  0x43   :  { %3617 = shalt.err (!%p3614_p3)
}
  0x44   :  { %71 = dma.hbm_to_vmem [thread:$0]  %s4187_s8, 16, %s69_s17, [#allocation9]  }
  0x45   :  { %3640 = dma.done.wait [#allocation3], 256  }
  0x46   :  { %3641 = vsyncadd [#allocation3], 4294967040 }
  0x47   :  { %3642 = dma.done.wait [#allocation6], 640  }
  0x48   :  { %3643 = vsyncadd [#allocation6], 4294966656 }
  0x49   :  { %3644 = dma.done.wait [#allocation9], 16  }
  0x4a   :  { %3645 = vsyncadd [#allocation9], 4294967280  ;;  %v3654_v0 = vmov 0.0|0.0   ;;  %vm3655_vm0 = vmmov 0   ;;  %v3656_v1 = vmov 0.0   ;;  %vm94_vm1 = vcmask 64512  }
  0x4b   :  { %3128 = vmatprep.subr.bf16.mxu1 %v3654_v0  ;;  %2938 = vmatprep.mubr.msk.f32.mxu1 %vm3655_vm0, %v3656_v1  ;;  %v176_v2 = vld [vmem:[%s4181_s2] sm:$0xff]  ;;  %v177_v3 = vld [vmem:[%s4181_s2 + $0x8] sm:$0xff]  ;;  %v86_v4 = vld [vmem:[#allocation5] sm:$0xff]  ;;  %s3657_s23 = smov 64   ;;  %vm311_vm2 = vcmask 1041409   ;;  %vm180_vm3 = vcmask 261120  }
  0x4c   :  { %v3774_v5 = vpack.c.bf16 %v177_v3, %v176_v2  ;;  %2925 = vmatprep.subr.mxu0 %v86_v4  ;;  %v84_v6 = vld [vmem:[#allocation2] sm:$0xff]  ;;  %v85_v7 = vld [vmem:[#allocation2 + $0x8] sm:$0xff]  ;;  %v178_v8 = vld [vmem:[%s4181_s2 + $0x10] sm:$0xff]  ;;  %vm1286_vm4 = vcmask 1040384   ;;  %vm1289_vm5 = vcmask 1041408   ;;  %vm1292_vm6 = vcmask 1042432  }
  0x4d   :  { %2926 = vmatpush3.msra.mxu0 %v86_v4  ;;  %2927 = vmatprep.mubr.msk.f32.mxu0 %vm94_vm1, %v84_v6  ;;  %v179_v9 = vld [vmem:[%s4181_s2 + $0x18] sm:$0xff]  ;;  %v2777_v13 = vld [vmem:[%s4182_s3] ss:$0 sm:$0xff]  ;;  %s3658_s3 = smov 32   ;;  %vm1295_vm7 = vcmask 1043456   ;;  %vm1298_vm8 = vcmask 1044480  }
  0x4e   :  { %3130 = vmatpush3.bf16.msra.mxu1 %v3774_v5  ;;  %2928 = vmatmul.mubr.msk.f32.vlgmr.msra.gmra.mrb[0].mxu0 %vm94_vm1, %v85_v7  ;;  %v3783_v10 = vpack.c.bf16 %v179_v9, %v178_v8  ;;  %vm1301_vm9 = vcmask 1045504   ;;  %vm1304_vm10 = vcmask 1046528   ;;  %vm2523_vm11 = vcmask 261127  }
  0x4f   :  { %3131 = vmatprep.subr.bf16.mxu1 %v3654_v0  ;;  %3134 = vmatprep.subr.bf16.mxu0 %v3654_v0  ;;  %vm2527_vm12 = vcmask 253952   ;;  %vm2758_vm13 = vcmask 25600  }
  0x50   :  { %3136 = vmatpush3.bf16.msra.mxu0 %v3774_v5  ;;  %2949 = vmatprep.mubr.msk.f32.mxu0 %vm3655_vm0, %v3656_v1 }
  0x51   :  { %3137 = vmatprep.subr.bf16.mxu0 %v3654_v0 }
  0x52   :  { %3133 = vmatpush3.bf16.msra.mxu1 %v3783_v10 }
  0x53   :  { %3140 = vmatprep.subr.bf16.mxu1 %v3654_v0 }
  0x54   :  { %3139 = vmatpush3.bf16.msra.mxu0 %v3783_v10 }
  0x55   :  { %2939 = vmatmul.mubr.f32.vlgmr.msra.gmra.mrb[0].mxu1 %v3656_v1  ;;  %3146 = vmatprep.subr.bf16.mxu0 %v3654_v0 }
  0x56   :  { %3142 = vmatpush3.bf16.msra.mxu1 %v3774_v5  ;;  %2960 = vmatprep.mubr.msk.f32.mxu1 %vm3655_vm0, %v3656_v1 }
  0x57   :  { %3143 = vmatprep.subr.bf16.mxu1 %v3654_v0 }
  0x5a   :  { %3145 = vmatpush3.bf16.msra.mxu1 %v3783_v10 }
  0x5b   :  { %3152 = vmatprep.subr.bf16.mxu1 %v3654_v0 }
 0x121   :  { %v2929_v11 = vpop.f32.mrb[0].mxu0 }
 0x122   :  { %v167_v12 = vpop.f32.mrb[1].mxu0  ;;  %v3805_v14 = vadd.f32 %v2929_v11, %v2777_v13 }
 0x123   :  { %v3807_v18 = vadd.f32 %v2777_v13, %v167_v12 }
 0x128   :  { %v250_v15 = vpop.f32.mrb[0].mxu1 }
 0x129   :  { %v255_v16 = vrot.slane %v250_v15, 1  ;;  %v2940_v17 = vpop.f32.mrb[1].mxu1  ;;  %v258_v20 = vadd.f32 %v250_v15, %v3807_v18 }
 0x12b   :  { %v259_v19 = vadd.f32 %v255_v16, %v3805_v14  ;;  %v2780_v24 = vmul.f32 -1.442695, %v258_v20 }
 0x12d   :  { %3250 = vtanh.f32 %v259_v19  ;;  %v2781_v23 = vmul.f32 -1.442695, %v259_v19 }
 0x12e   :  { %3252 = vtanh.f32 %v258_v20 }
 0x12f   :  { %3254 = vpow2.f32 %v2781_v23 }
 0x130   :  { %3256 = vpow2.f32 %v2780_v24 }
 0x137   :  { %v3251_v21 = vpop.eup %3250 }
 0x138   :  { %280 = vrot.lane.b32.xlu0 %v3251_v21, %s3657_s23  ;;  %v3253_v22 = vpop.eup %3252 }
 0x139   :  { %v3255_v25 = vpop.eup %3254 }
 0x13a   :  { %v267_v26 = vadd.f32 1.0, %v3255_v25  ;;  %v3257_v27 = vpop.eup %3256 }
 0x13b   :  { %v266_v28 = vadd.f32 1.0, %v3257_v27 }
 0x13c   :  { %278 = vrot.lane.b32.xlu0 %v3253_v22, %s3657_s23  ;;  %3258 = vrcp.f32 %v267_v26 }
 0x13d   :  { %3260 = vrcp.f32 %v266_v28 }
 0x146   :  { %v3259_v29 = vpop.eup %3258 }
 0x147   :  { %v3261_v32 = vpop.eup %3260  ;;  %v275_v35 = vmul.f32 0.0, %v3259_v29 }
 0x148   :  { %v274_v38 = vmul.f32 0.0, %v3261_v32 }
 0x1aa   :  { %v281_v30 = vpop.permute.xlu0 %280 }
 0x1ab   :  { %v285_v31 = vmul.f32 %v3259_v29, %v281_v30 }
 0x1ad   :  { %290 = vrot.lane.b32.xlu1 %v285_v31, %s3658_s3 }
 0x1ae   :  { %v279_v33 = vpop.permute.xlu0 %278 }
 0x1af   :  { %v284_v34 = vmul.f32 %v3261_v32, %v279_v33 }
 0x1b1   :  { %288 = vrot.lane.b32.xlu1 %v284_v34, %s3658_s3 }
 0x21f   :  { %v291_v36 = vpop.permute.xlu1 %290 }
 0x220   :  { %v295_v37 = vadd.f32 %v291_v36, %v275_v35 }
 0x222   :  { %3262 = vtanh.f32 %v295_v37  ;;  %v410_v8 = vrot.slane %v295_v37, 7 }
 0x223   :  { %v289_v39 = vpop.permute.xlu1 %288 }
 0x224   :  { %v294_v40 = vadd.f32 %v289_v39, %v274_v38 }
 0x226   :  { %3264 = vtanh.f32 %v294_v40  ;;  %v409_v11 = vrot.slane %v294_v40, 7 }
 0x22c   :  { %v3263_v41 = vpop.eup %3262 }
 0x22d   :  { %302 = vrot.lane.b32.xlu0 %v3263_v41, %s3657_s23 }
 0x230   :  { %v3265_v42 = vpop.eup %3264 }
 0x231   :  { %300 = vrot.lane.b32.xlu1 %v3265_v42, %s3657_s23 }
 0x29f   :  { %v303_v43 = vpop.permute.xlu0 %302 }
 0x2a0   :  { %v3817_v44 = vmul.f32 %v3259_v29, %v303_v43 }
 0x2a2   :  { %v310_v46 = vrot.slane %v3817_v44, 7 }
 0x2a3   :  { %v301_v45 = vpop.permute.xlu1 %300 }
 0x2a4   :  { %v3820_v47 = vmul.f32 %v3261_v32, %v301_v45 }
 0x2a6   :  { %v312_v48 = vsel %vm311_vm2, %v310_v46, %v3820_v47 }
 0x2a7   :  { %313 = vrot.lane.b32.xlu0 %v312_v48, %s3658_s3 }
 0x319   :  { %v314_v49 = vpop.permute.xlu0 %313 }
 0x31a   :  { %2950 = vmatmul.mubr.msk.f32.vlgmr.msra.gmra.mrb[2].mxu0 %vm180_vm3, %v314_v49 }
 0x31b   :  { %3148 = vmatpush3.bf16.msra.mxu0 %v3774_v5  ;;  %2971 = vmatprep.mubr.msk.f32.mxu0 %vm3655_vm0, %v3656_v1 }
 0x31c   :  { %3149 = vmatprep.subr.bf16.mxu0 %v3654_v0 }
 0x31f   :  { %3151 = vmatpush3.bf16.msra.mxu0 %v3783_v10 }
 0x320   :  { %3158 = vmatprep.subr.bf16.mxu0 %v3654_v0 }
 0x3ed   :  { %v383_v50 = vpop.f32.mrb[2].mxu0 }
 0x3ee   :  { %v388_v51 = vrot.slane %v383_v50, 7  ;;  %v392_v52 = vadd.f32 %v383_v50, %v3805_v14  ;;  %v2951_v53 = vpop.f32.mrb[3].mxu0 }
 0x3f0   :  { %v391_v54 = vadd.f32 %v388_v51, %v3807_v18  ;;  %3266 = vtanh.f32 %v392_v52  ;;  %v2784_v57 = vmul.f32 -1.442695, %v392_v52 }
 0x3f2   :  { %3268 = vtanh.f32 %v391_v54  ;;  %v2783_v58 = vmul.f32 -1.442695, %v391_v54 }
 0x3f3   :  { %3270 = vpow2.f32 %v2784_v57 }
 0x3f4   :  { %3272 = vpow2.f32 %v2783_v58 }
 0x3fa   :  { %v3267_v55 = vpop.eup %3266 }
 0x3fb   :  { %419 = vrot.lane.b32.xlu0 %v3267_v55, %s3657_s23 }
 0x3fc   :  { %v3269_v56 = vpop.eup %3268 }
 0x3fd   :  { %417 = vrot.lane.b32.xlu1 %v3269_v56, %s3657_s23  ;;  %v3271_v59 = vpop.eup %3270 }
 0x3fe   :  { %v3273_v60 = vpop.eup %3272  ;;  %v400_v61 = vadd.f32 1.0, %v3271_v59 }
 0x3ff   :  { %v399_v62 = vadd.f32 1.0, %v3273_v60 }
 0x400   :  { %3274 = vrcp.f32 %v400_v61 }
 0x401   :  { %3276 = vrcp.f32 %v399_v62 }
 0x40a   :  { %v3275_v63 = vpop.eup %3274 }
 0x40b   :  { %v3277_v4 = vpop.eup %3276  ;;  %v414_v9 = vmul.f32 %v3275_v63, %v410_v8 }
 0x40c   :  { %v413_v15 = vmul.f32 %v3277_v4, %v409_v11 }
 0x46d   :  { %v420_v2 = vpop.permute.xlu0 %419 }
 0x46e   :  { %v424_v3 = vmul.f32 %v3275_v63, %v420_v2 }
 0x46f   :  { %v418_v6 = vpop.permute.xlu1 %417 }
 0x470   :  { %429 = vrot.lane.b32.xlu0 %v424_v3, %s3658_s3  ;;  %v423_v7 = vmul.f32 %v3277_v4, %v418_v6 }
 0x472   :  { %427 = vrot.lane.b32.xlu1 %v423_v7, %s3658_s3 }
 0x4e2   :  { %v430_v12 = vpop.permute.xlu0 %429 }
 0x4e3   :  { %v434_v13 = vadd.f32 %v430_v12, %v414_v9 }
 0x4e4   :  { %v428_v16 = vpop.permute.xlu1 %427 }
 0x4e5   :  { %3278 = vtanh.f32 %v434_v13  ;;  %v433_v17 = vadd.f32 %v428_v16, %v413_v15  ;;  %v549_v51 = vrot.slane %v434_v13, 7 }
 0x4e7   :  { %3280 = vtanh.f32 %v433_v17  ;;  %v548_v50 = vrot.slane %v433_v17, 7 }
 0x4ef   :  { %v3279_v19 = vpop.eup %3278 }
 0x4f0   :  { %441 = vrot.lane.b32.xlu0 %v3279_v19, %s3657_s23 }
 0x4f1   :  { %v3281_v20 = vpop.eup %3280 }
 0x4f2   :  { %439 = vrot.lane.b32.xlu1 %v3281_v20, %s3657_s23 }
 0x562   :  { %v442_v21 = vpop.permute.xlu0 %441 }
 0x563   :  { %v3840_v24 = vmul.f32 %v3275_v63, %v442_v21 }
 0x564   :  { %v440_v22 = vpop.permute.xlu1 %439 }
 0x565   :  { %v445_v23 = vmul.f32 %v3277_v4, %v440_v22  ;;  %v1288_v3 = vsel %vm1286_vm4, %v3817_v44, %v3840_v24 }
 0x567   :  { %v449_v25 = vrot.slane %v445_v23, 1  ;;  %v1287_v63 = vsel %vm1286_vm4, %v3820_v47, %v445_v23 }
 0x569   :  { %v450_v26 = vsel %vm311_vm2, %v3840_v24, %v449_v25 }
 0x56a   :  { %451 = vrot.lane.b32.xlu1 %v450_v26, %s3658_s3 }
 0x5dc   :  { %v452_v27 = vpop.permute.xlu1 %451 }
 0x5dd   :  { %2961 = vmatmul.mubr.msk.f32.vlgmr.msra.gmra.mrb[2].mxu1 %vm180_vm3, %v452_v27 }
 0x5de   :  { %3154 = vmatpush3.bf16.msra.mxu1 %v3774_v5  ;;  %2982 = vmatprep.mubr.msk.f32.mxu1 %vm3655_vm0, %v3656_v1 }
 0x5df   :  { %3155 = vmatprep.subr.bf16.mxu1 %v3654_v0 }
 0x5e2   :  { %3157 = vmatpush3.bf16.msra.mxu1 %v3783_v10 }
 0x5e3   :  { %3164 = vmatprep.subr.bf16.mxu1 %v3654_v0 }
 0x6b0   :  { %v521_v28 = vpop.f32.mrb[2].mxu1 }
 0x6b1   :  { %v526_v29 = vrot.slane %v521_v28, 6  ;;  %v527_v30 = vrot.slane %v521_v28, 7  ;;  %v2962_v31 = vpop.f32.mrb[3].mxu1 }
 0x6b3   :  { %v530_v32 = vadd.f32 %v526_v29, %v3807_v18  ;;  %v531_v33 = vadd.f32 %v527_v30, %v3805_v14 }
 0x6b5   :  { %3282 = vtanh.f32 %v530_v32  ;;  %v2786_v36 = vmul.f32 -1.442695, %v530_v32  ;;  %v2787_v37 = vmul.f32 -1.442695, %v531_v33 }
 0x6b6   :  { %3284 = vtanh.f32 %v531_v33 }
 0x6b7   :  { %3286 = vpow2.f32 %v2786_v36 }
 0x6b8   :  { %3288 = vpow2.f32 %v2787_v37 }
 0x6bf   :  { %v3283_v34 = vpop.eup %3282 }
 0x6c0   :  { %v3285_v35 = vpop.eup %3284  ;;  %556 = vrot.lane.b32.xlu0 %v3283_v34, %s3657_s23 }
 0x6c1   :  { %558 = vrot.lane.b32.xlu1 %v3285_v35, %s3657_s23  ;;  %v3287_v38 = vpop.eup %3286 }
 0x6c2   :  { %v3289_v39 = vpop.eup %3288  ;;  %v538_v40 = vadd.f32 1.0, %v3287_v38 }
 0x6c3   :  { %v539_v41 = vadd.f32 1.0, %v3289_v39 }
 0x6c4   :  { %3290 = vrcp.f32 %v538_v40 }
 0x6c5   :  { %3292 = vrcp.f32 %v539_v41 }
 0x6ce   :  { %v3291_v42 = vpop.eup %3290 }
 0x6cf   :  { %v3293_v45 = vpop.eup %3292  ;;  %v552_v52 = vmul.f32 %v3291_v42, %v548_v50 }
 0x6d0   :  { %v553_v53 = vmul.f32 %v3293_v45, %v549_v51 }
 0x732   :  { %v557_v43 = vpop.permute.xlu0 %556 }
 0x733   :  { %v559_v46 = vpop.permute.xlu1 %558  ;;  %v562_v48 = vmul.f32 %v3291_v42, %v557_v43 }
 0x734   :  { %v563_v49 = vmul.f32 %v3293_v45, %v559_v46 }
 0x735   :  { %566 = vrot.lane.b32.xlu0 %v562_v48, %s3658_s3 }
 0x736   :  { %568 = vrot.lane.b32.xlu1 %v563_v49, %s3658_s3 }
 0x7a7   :  { %v567_v54 = vpop.permute.xlu0 %566 }
 0x7a8   :  { %v569_v55 = vpop.permute.xlu1 %568  ;;  %v572_v56 = vadd.f32 %v567_v54, %v552_v52 }
 0x7a9   :  { %v573_v57 = vadd.f32 %v569_v55, %v553_v53 }
 0x7aa   :  { %3294 = vtanh.f32 %v572_v56  ;;  %v688_v32 = vrot.slane %v572_v56, 7 }
 0x7ab   :  { %3296 = vtanh.f32 %v573_v57  ;;  %v689_v33 = vrot.slane %v573_v57, 7 }
 0x7b4   :  { %v3295_v58 = vpop.eup %3294 }
 0x7b5   :  { %v3297_v59 = vpop.eup %3296  ;;  %578 = vrot.lane.b32.xlu0 %v3295_v58, %s3657_s23 }
 0x7b6   :  { %580 = vrot.lane.b32.xlu1 %v3297_v59, %s3657_s23 }
 0x827   :  { %v579_v60 = vpop.permute.xlu0 %578 }
 0x828   :  { %v581_v61 = vpop.permute.xlu1 %580  ;;  %v584_v62 = vmul.f32 %v3291_v42, %v579_v60 }
 0x829   :  { %v585_v2 = vmul.f32 %v3293_v45, %v581_v61 }
 0x82a   :  { %v588_v4 = vrot.slane %v584_v62, 2  ;;  %v3865_v6 = vsel %vm1289_vm5, %v1287_v63, %v584_v62 }
 0x82b   :  { %v589_v7 = vrot.slane %v585_v2, 1  ;;  %v3867_v8 = vsel %vm1289_vm5, %v1288_v3, %v585_v2 }
 0x82d   :  { %v590_v9 = vsel %vm311_vm2, %v589_v7, %v588_v4 }
 0x82e   :  { %591 = vrot.lane.b32.xlu0 %v590_v9, %s3658_s3 }
 0x8a0   :  { %v592_v11 = vpop.permute.xlu0 %591 }
 0x8a1   :  { %2972 = vmatmul.mubr.msk.f32.vlgmr.msra.gmra.mrb[4].mxu0 %vm180_vm3, %v592_v11 }
 0x8a2   :  { %3160 = vmatpush3.bf16.msra.mxu0 %v3774_v5  ;;  %2993 = vmatprep.mubr.msk.f32.mxu0 %vm3655_vm0, %v3656_v1 }
 0x8a3   :  { %3161 = vmatprep.subr.bf16.mxu0 %v3654_v0 }
 0x8a6   :  { %3163 = vmatpush3.bf16.msra.mxu0 %v3783_v10 }
 0x8a7   :  { %3170 = vmatprep.subr.bf16.mxu0 %v3654_v0 }
 0x974   :  { %v661_v44 = vpop.f32.mrb[4].mxu0 }
 0x975   :  { %v666_v47 = vrot.slane %v661_v44, 5  ;;  %v667_v12 = vrot.slane %v661_v44, 6  ;;  %v2973_v13 = vpop.f32.mrb[5].mxu0 }
 0x977   :  { %v670_v15 = vadd.f32 %v666_v47, %v3807_v18  ;;  %v671_v16 = vadd.f32 %v667_v12, %v3805_v14 }
 0x979   :  { %3298 = vtanh.f32 %v670_v15  ;;  %v2789_v20 = vmul.f32 -1.442695, %v670_v15  ;;  %v2790_v21 = vmul.f32 -1.442695, %v671_v16 }
 0x97a   :  { %3300 = vtanh.f32 %v671_v16 }
 0x97b   :  { %3302 = vpow2.f32 %v2789_v20 }
 0x97c   :  { %3304 = vpow2.f32 %v2790_v21 }
 0x983   :  { %v3299_v17 = vpop.eup %3298 }
 0x984   :  { %v3301_v19 = vpop.eup %3300  ;;  %696 = vrot.lane.b32.xlu1 %v3299_v17, %s3657_s23 }
 0x985   :  { %698 = vrot.lane.b32.xlu0 %v3301_v19, %s3657_s23  ;;  %v3303_v22 = vpop.eup %3302 }
 0x986   :  { %v3305_v23 = vpop.eup %3304  ;;  %v678_v24 = vadd.f32 1.0, %v3303_v22 }
 0x987   :  { %v679_v25 = vadd.f32 1.0, %v3305_v23 }
 0x988   :  { %3306 = vrcp.f32 %v678_v24 }
 0x989   :  { %3308 = vrcp.f32 %v679_v25 }
 0x992   :  { %v3307_v26 = vpop.eup %3306 }
 0x993   :  { %v3309_v28 = vpop.eup %3308  ;;  %v692_v34 = vmul.f32 %v3307_v26, %v688_v32 }
 0x994   :  { %v693_v35 = vmul.f32 %v3309_v28, %v689_v33 }
 0x9f6   :  { %v697_v27 = vpop.permute.xlu1 %696 }
 0x9f7   :  { %v699_v29 = vpop.permute.xlu0 %698  ;;  %v702_v30 = vmul.f32 %v3307_v26, %v697_v27 }
 0x9f8   :  { %v703_v31 = vmul.f32 %v3309_v28, %v699_v29 }
 0x9f9   :  { %706 = vrot.lane.b32.xlu1 %v702_v30, %s3658_s3 }
 0x9fa   :  { %708 = vrot.lane.b32.xlu0 %v703_v31, %s3658_s3 }
 0xa6b   :  { %v707_v36 = vpop.permute.xlu1 %706 }
 0xa6c   :  { %v709_v37 = vpop.permute.xlu0 %708  ;;  %v712_v38 = vadd.f32 %v707_v36, %v692_v34 }
 0xa6d   :  { %v713_v39 = vadd.f32 %v709_v37, %v693_v35 }
 0xa6e   :  { %3310 = vtanh.f32 %v712_v38  ;;  %v828_v12 = vrot.slane %v712_v38, 7 }
 0xa6f   :  { %3312 = vtanh.f32 %v713_v39  ;;  %v829_v13 = vrot.slane %v713_v39, 7 }
 0xa78   :  { %v3311_v40 = vpop.eup %3310 }
 0xa79   :  { %v3313_v41 = vpop.eup %3312  ;;  %718 = vrot.lane.b32.xlu1 %v3311_v40, %s3657_s23 }
 0xa7a   :  { %720 = vrot.lane.b32.xlu0 %v3313_v41, %s3657_s23 }
 0xaeb   :  { %v719_v42 = vpop.permute.xlu1 %718 }
 0xaec   :  { %v721_v43 = vpop.permute.xlu0 %720  ;;  %v724_v45 = vmul.f32 %v3307_v26, %v719_v42 }
 0xaed   :  { %v725_v46 = vmul.f32 %v3309_v28, %v721_v43 }
 0xaee   :  { %v728_v48 = vrot.slane %v724_v45, 3  ;;  %v1293_v49 = vsel %vm1292_vm6, %v3865_v6, %v724_v45 }
 0xaef   :  { %v729_v50 = vrot.slane %v725_v46, 2  ;;  %v1294_v51 = vsel %vm1292_vm6, %v3867_v8, %v725_v46 }
 0xaf1   :  { %v730_v52 = vsel %vm311_vm2, %v729_v50, %v728_v48 }
 0xaf2   :  { %731 = vrot.lane.b32.xlu1 %v730_v52, %s3658_s3 }
 0xb64   :  { %v732_v53 = vpop.permute.xlu1 %731 }
 0xb65   :  { %2983 = vmatmul.mubr.msk.f32.vlgmr.msra.gmra.mrb[4].mxu1 %vm180_vm3, %v732_v53 }
 0xb66   :  { %3166 = vmatpush3.bf16.msra.mxu1 %v3774_v5  ;;  %3004 = vmatprep.mubr.msk.f32.mxu1 %vm3655_vm0, %v3656_v1 }
 0xb67   :  { %3167 = vmatprep.subr.bf16.mxu1 %v3654_v0 }
 0xb6a   :  { %3169 = vmatpush3.bf16.msra.mxu1 %v3783_v10 }
 0xc38   :  { %v801_v54 = vpop.f32.mrb[4].mxu1 }
 0xc39   :  { %v806_v55 = vrot.slane %v801_v54, 4  ;;  %v807_v56 = vrot.slane %v801_v54, 5  ;;  %v2984_v57 = vpop.f32.mrb[5].mxu1 }
 0xc3b   :  { %v810_v58 = vadd.f32 %v806_v55, %v3807_v18  ;;  %v811_v59 = vadd.f32 %v807_v56, %v3805_v14 }
 0xc3d   :  { %3314 = vtanh.f32 %v810_v58  ;;  %v2792_v62 = vmul.f32 -1.442695, %v810_v58  ;;  %v2793_v63 = vmul.f32 -1.442695, %v811_v59 }
 0xc3e   :  { %3316 = vtanh.f32 %v811_v59 }
 0xc3f   :  { %3318 = vpow2.f32 %v2792_v62 }
 0xc40   :  { %3320 = vpow2.f32 %v2793_v63 }
 0xc47   :  { %v3315_v60 = vpop.eup %3314 }
 0xc48   :  { %v3317_v61 = vpop.eup %3316  ;;  %836 = vrot.lane.b32.xlu0 %v3315_v60, %s3657_s23 }
 0xc49   :  { %838 = vrot.lane.b32.xlu1 %v3317_v61, %s3657_s23  ;;  %v3319_v2 = vpop.eup %3318 }
 0xc4a   :  { %v3321_v3 = vpop.eup %3320  ;;  %v818_v4 = vadd.f32 1.0, %v3319_v2 }
 0xc4b   :  { %v819_v6 = vadd.f32 1.0, %v3321_v3 }
 0xc4c   :  { %3322 = vrcp.f32 %v818_v4 }
 0xc4d   :  { %3324 = vrcp.f32 %v819_v6 }
 0xc56   :  { %v3323_v7 = vpop.eup %3322 }
 0xc57   :  { %v3325_v9 = vpop.eup %3324  ;;  %v832_v15 = vmul.f32 %v3323_v7, %v828_v12 }
 0xc58   :  { %v833_v16 = vmul.f32 %v3325_v9, %v829_v13 }
 0xcba   :  { %v837_v8 = vpop.permute.xlu0 %836 }
 0xcbb   :  { %v839_v11 = vpop.permute.xlu1 %838  ;;  %v842_v44 = vmul.f32 %v3323_v7, %v837_v8 }
 0xcbc   :  { %v843_v47 = vmul.f32 %v3325_v9, %v839_v11 }
 0xcbd   :  { %846 = vrot.lane.b32.xlu0 %v842_v44, %s3658_s3 }
 0xcbe   :  { %848 = vrot.lane.b32.xlu1 %v843_v47, %s3658_s3 }
 0xd2f   :  { %v847_v17 = vpop.permute.xlu0 %846 }
 0xd30   :  { %v849_v19 = vpop.permute.xlu1 %848  ;;  %v852_v20 = vadd.f32 %v847_v17, %v832_v15 }
 0xd31   :  { %v853_v21 = vadd.f32 %v849_v19, %v833_v16 }
 0xd32   :  { %3326 = vtanh.f32 %v852_v20  ;;  %v968_v54 = vrot.slane %v852_v20, 7 }
 0xd33   :  { %3328 = vtanh.f32 %v853_v21  ;;  %v969_v55 = vrot.slane %v853_v21, 7 }
 0xd3c   :  { %v3327_v22 = vpop.eup %3326 }
 0xd3d   :  { %v3329_v23 = vpop.eup %3328  ;;  %858 = vrot.lane.b32.xlu0 %v3327_v22, %s3657_s23 }
 0xd3e   :  { %860 = vrot.lane.b32.xlu1 %v3329_v23, %s3657_s23 }
 0xdaf   :  { %v859_v24 = vpop.permute.xlu0 %858 }
 0xdb0   :  { %v861_v25 = vpop.permute.xlu1 %860  ;;  %v864_v26 = vmul.f32 %v3323_v7, %v859_v24 }
 0xdb1   :  { %v865_v27 = vmul.f32 %v3325_v9, %v861_v25 }
 0xdb2   :  { %v868_v28 = vrot.slane %v864_v26, 4  ;;  %v3904_v29 = vsel %vm1295_vm7, %v1293_v49, %v864_v26 }
 0xdb3   :  { %v869_v30 = vrot.slane %v865_v27, 3  ;;  %v3906_v31 = vsel %vm1295_vm7, %v1294_v51, %v865_v27 }
 0xdb5   :  { %v870_v32 = vsel %vm311_vm2, %v869_v30, %v868_v28 }
 0xdb6   :  { %871 = vrot.lane.b32.xlu0 %v870_v32, %s3658_s3 }
 0xe28   :  { %v872_v33 = vpop.permute.xlu0 %871 }
 0xe29   :  { %2994 = vmatmul.mubr.msk.f32.vlgmr.msra.gmra.mrb[6].mxu0 %vm180_vm3, %v872_v33 }
 0xe2a   :  { %3172 = vmatpush3.bf16.msra.mxu0 %v3774_v5  ;;  %3015 = vmatprep.mubr.msk.f32.mxu0 %vm3655_vm0, %v3656_v1 }
 0xe2b   :  { %3173 = vmatprep.subr.bf16.mxu0 %v3654_v0 }
 0xe2e   :  { %3175 = vmatpush3.bf16.msra.mxu0 %v3783_v10 }
 0xe2f   :  { %3184 = vmatprep.subr.bf16.mxu0 %v3654_v0 }
 0xefc   :  { %v941_v34 = vpop.f32.mrb[6].mxu0 }
 0xefd   :  { %v946_v35 = vrot.slane %v941_v34, 3  ;;  %v947_v36 = vrot.slane %v941_v34, 4  ;;  %v2995_v37 = vpop.f32.mrb[7].mxu0 }
 0xeff   :  { %v950_v38 = vadd.f32 %v946_v35, %v3807_v18  ;;  %v951_v39 = vadd.f32 %v947_v36, %v3805_v14 }
 0xf01   :  { %3330 = vtanh.f32 %v950_v38  ;;  %v2795_v41 = vmul.f32 -1.442695, %v950_v38  ;;  %v2796_v10 = vmul.f32 -1.442695, %v951_v39 }
 0xf02   :  { %3332 = vtanh.f32 %v951_v39 }
 0xf03   :  { %3334 = vpow2.f32 %v2795_v41 }
 0xf04   :  { %3336 = vpow2.f32 %v2796_v10 }
 0xf0b   :  { %v3331_v5 = vpop.eup %3330 }
 0xf0c   :  { %v3333_v40 = vpop.eup %3332  ;;  %976 = vrot.lane.b32.xlu1 %v3331_v5, %s3657_s23 }
 0xf0d   :  { %978 = vrot.lane.b32.xlu0 %v3333_v40, %s3657_s23  ;;  %v3335_v42 = vpop.eup %3334 }
 0xf0e   :  { %v3337_v43 = vpop.eup %3336  ;;  %v958_v45 = vadd.f32 1.0, %v3335_v42 }
 0xf0f   :  { %v959_v46 = vadd.f32 1.0, %v3337_v43 }
 0xf10   :  { %3338 = vrcp.f32 %v958_v45 }
 0xf11   :  { %3340 = vrcp.f32 %v959_v46 }
 0xf1a   :  { %v3339_v48 = vpop.eup %3338 }
 0xf1b   :  { %v3341_v50 = vpop.eup %3340  ;;  %v972_v56 = vmul.f32 %v3339_v48, %v968_v54 }
 0xf1c   :  { %v973_v57 = vmul.f32 %v3341_v50, %v969_v55 }
 0xf7e   :  { %v977_v49 = vpop.permute.xlu1 %976 }
 0xf7f   :  { %v979_v51 = vpop.permute.xlu0 %978  ;;  %v982_v52 = vmul.f32 %v3339_v48, %v977_v49 }
 0xf80   :  { %v983_v53 = vmul.f32 %v3341_v50, %v979_v51 }
 0xf81   :  { %986 = vrot.lane.b32.xlu1 %v982_v52, %s3658_s3 }
 0xf82   :  { %988 = vrot.lane.b32.xlu0 %v983_v53, %s3658_s3 }
 0xff3   :  { %v987_v58 = vpop.permute.xlu1 %986 }
 0xff4   :  { %v989_v59 = vpop.permute.xlu0 %988  ;;  %v992_v60 = vadd.f32 %v987_v58, %v972_v56 }
 0xff5   :  { %v993_v61 = vadd.f32 %v989_v59, %v973_v57 }
 0xff6   :  { %3342 = vtanh.f32 %v992_v60  ;;  %v1108_v34 = vrot.slane %v992_v60, 7 }
 0xff7   :  { %3344 = vtanh.f32 %v993_v61  ;;  %v1109_v35 = vrot.slane %v993_v61, 7 }
0x1000   :  { %v3343_v62 = vpop.eup %3342 }
0x1001   :  { %v3345_v63 = vpop.eup %3344  ;;  %998 = vrot.lane.b32.xlu1 %v3343_v62, %s3657_s23 }
0x1002   :  { %1000 = vrot.lane.b32.xlu0 %v3345_v63, %s3657_s23 }
0x1073   :  { %v999_v2 = vpop.permute.xlu1 %998 }
0x1074   :  { %v1001_v3 = vpop.permute.xlu0 %1000  ;;  %v1004_v4 = vmul.f32 %v3339_v48, %v999_v2 }
0x1075   :  { %v1005_v6 = vmul.f32 %v3341_v50, %v1001_v3 }
0x1076   :  { %v1008_v7 = vrot.slane %v1004_v4, 5  ;;  %v1299_v8 = vsel %vm1298_vm8, %v3904_v29, %v1004_v4 }
0x1077   :  { %v1009_v9 = vrot.slane %v1005_v6, 4  ;;  %v1300_v11 = vsel %vm1298_vm8, %v3906_v31, %v1005_v6 }
0x1079   :  { %v1010_v44 = vsel %vm311_vm2, %v1009_v9, %v1008_v7 }
0x107a   :  { %1011 = vrot.lane.b32.xlu1 %v1010_v44, %s3658_s3 }
0x10ec   :  { %v1012_v47 = vpop.permute.xlu1 %1011 }
0x10ed   :  { %3005 = vmatmul.mubr.msk.f32.vlgmr.msra.gmra.mrb[6].mxu1 %vm180_vm3, %v1012_v47 }
0x11c0   :  { %v1081_v12 = vpop.f32.mrb[6].mxu1 }
0x11c1   :  { %v1086_v13 = vrot.slane %v1081_v12, 2  ;;  %v1087_v15 = vrot.slane %v1081_v12, 3  ;;  %v3006_v16 = vpop.f32.mrb[7].mxu1 }
0x11c3   :  { %v1090_v17 = vadd.f32 %v1086_v13, %v3807_v18  ;;  %v1091_v19 = vadd.f32 %v1087_v15, %v3805_v14 }
0x11c5   :  { %3346 = vtanh.f32 %v1090_v17  ;;  %v2798_v22 = vmul.f32 -1.442695, %v1090_v17  ;;  %v2799_v23 = vmul.f32 -1.442695, %v1091_v19 }
0x11c6   :  { %3348 = vtanh.f32 %v1091_v19 }
0x11c7   :  { %3350 = vpow2.f32 %v2798_v22  ;;  %v1403_v22 = vld [vmem:[#allocation7] sm:$0xff] }
0x11c8   :  { %3352 = vpow2.f32 %v2799_v23 }
0x11cf   :  { %v3347_v20 = vpop.eup %3346 }
0x11d0   :  { %v3349_v21 = vpop.eup %3348  ;;  %1116 = vrot.lane.b32.xlu0 %v3347_v20, %s3657_s23  ;;  %v1307_v20 = vld [vmem:[%s4183_s4] sm:$0xff] }
0x11d1   :  { %1118 = vrot.lane.b32.xlu1 %v3349_v21, %s3657_s23  ;;  %v3351_v24 = vpop.eup %3350  ;;  %v1308_v21 = vld [vmem:[%s4183_s4 + $0x8] sm:$0xff] }
0x11d2   :  { %v3353_v25 = vpop.eup %3352  ;;  %v1098_v26 = vadd.f32 1.0, %v3351_v24  ;;  %v3176_v23 = vpack.c.bf16 %v1308_v21, %v1307_v20  ;;  %v1404_v24 = vld [vmem:[#allocation7 + $0x8] sm:$0xff] }
0x11d3   :  { %v1099_v27 = vadd.f32 1.0, %v3353_v25  ;;  %v1309_v25 = vld [vmem:[%s4183_s4 + $0x10] sm:$0xff] }
0x11d4   :  { %3354 = vrcp.f32 %v1098_v26  ;;  %v1310_v26 = vld [vmem:[%s4183_s4 + $0x18] sm:$0xff]  ;;  %3177 = vmatprep.subr.bf16.mxu1 %v3176_v23 }
0x11d5   :  { %3356 = vrcp.f32 %v1099_v27  ;;  %v3965_v27 = vpack.c.bf16 %v1404_v24, %v1403_v22  ;;  %3179 = vmatpush3.bf16.msra.mxu1 %v3176_v23 }
0x11de   :  { %v3355_v28 = vpop.eup %3354 }
0x11df   :  { %v3357_v30 = vpop.eup %3356  ;;  %v1112_v36 = vmul.f32 %v3355_v28, %v1108_v34 }
0x11e0   :  { %v1113_v37 = vmul.f32 %v3357_v30, %v1109_v35 }
0x1242   :  { %v1117_v29 = vpop.permute.xlu0 %1116 }
0x1243   :  { %v1119_v31 = vpop.permute.xlu1 %1118  ;;  %v1122_v32 = vmul.f32 %v3355_v28, %v1117_v29  ;;  %v1405_v29 = vld [vmem:[#allocation7 + $0x10] sm:$0xff] }
0x1244   :  { %v1123_v33 = vmul.f32 %v3357_v30, %v1119_v31 }
0x1245   :  { %1126 = vrot.lane.b32.xlu0 %v1122_v32, %s3658_s3 }
0x1246   :  { %1128 = vrot.lane.b32.xlu1 %v1123_v33, %s3658_s3 }
0x12b7   :  { %v1127_v38 = vpop.permute.xlu0 %1126 }
0x12b8   :  { %v1129_v39 = vpop.permute.xlu1 %1128  ;;  %v1132_v5 = vadd.f32 %v1127_v38, %v1112_v36 }
0x12b9   :  { %v1133_v40 = vadd.f32 %v1129_v39, %v1113_v37 }
0x12ba   :  { %3358 = vtanh.f32 %v1132_v5  ;;  %v1248_v44 = vrot.slane %v1132_v5, 7 }
0x12bb   :  { %3360 = vtanh.f32 %v1133_v40  ;;  %v1249_v47 = vrot.slane %v1133_v40, 7 }
0x12c4   :  { %v3359_v41 = vpop.eup %3358 }
0x12c5   :  { %v3361_v10 = vpop.eup %3360  ;;  %1138 = vrot.lane.b32.xlu0 %v3359_v41, %s3657_s23 }
0x12c6   :  { %1140 = vrot.lane.b32.xlu1 %v3361_v10, %s3657_s23 }
0x1337   :  { %v1139_v42 = vpop.permute.xlu0 %1138 }
0x1338   :  { %v1141_v43 = vpop.permute.xlu1 %1140  ;;  %v1144_v45 = vmul.f32 %v3355_v28, %v1139_v42  ;;  %v3180_v28 = vpack.c.bf16 %v1310_v26, %v1309_v25  ;;  %v2803_v42 = vld [vmem:[%s4185_s6] ss:$0 sm:$0xff] }
0x1339   :  { %v1145_v46 = vmul.f32 %v3357_v30, %v1141_v43  ;;  %v1406_v30 = vld [vmem:[#allocation7 + $0x18] sm:$0xff] }
0x133a   :  { %v1148_v48 = vrot.slane %v1144_v45, 6  ;;  %v3938_v49 = vsel %vm1301_vm9, %v1299_v8, %v1144_v45  ;;  %v3968_v31 = vpack.c.bf16 %v1406_v30, %v1405_v29  ;;  %3181 = vmatprep.subr.bf16.mxu1 %v3180_v28 }
0x133b   :  { %v1149_v50 = vrot.slane %v1145_v46, 5  ;;  %v3940_v51 = vsel %vm1301_vm9, %v1300_v11, %v1145_v46  ;;  %3183 = vmatpush3.bf16.msra.mxu1 %v3180_v28 }
0x133c   :  { %3190 = vmatprep.subr.bf16.mxu1 %v3654_v0 }
0x133d   :  { %v1150_v52 = vsel %vm311_vm2, %v1149_v50, %v1148_v48 }
0x133e   :  { %1151 = vrot.lane.b32.xlu0 %v1150_v52, %s3658_s3 }
0x13b0   :  { %v1152_v53 = vpop.permute.xlu0 %1151 }
0x13b1   :  { %3016 = vmatmul.mubr.msk.f32.vlgmr.msra.gmra.mrb[8].mxu0 %vm180_vm3, %v1152_v53 }
0x13b2   :  { %3037 = vmatprep.mubr.msk.f32.mxu0 %vm3655_vm0, %v3656_v1  ;;  %3186 = vmatpush3.bf16.msra.mxu0 %v3965_v27 }
0x13b3   :  { %3187 = vmatprep.subr.bf16.mxu0 %v3654_v0 }
0x13b6   :  { %3189 = vmatpush3.bf16.msra.mxu0 %v3968_v31 }
0x13b7   :  { %3196 = vmatprep.subr.bf16.mxu0 %v3654_v0 }
0x13b9   :  { %3038 = vmatmul.mubr.f32.vlgmr.msra.gmra.mrb[10].mxu0 %v3656_v1 }
0x13ba   :  { %3198 = vmatpush3.bf16.msra.mxu0 %v3965_v27  ;;  %3059 = vmatprep.mubr.msk.f32.mxu0 %vm3655_vm0, %v3656_v1 }
0x13bb   :  { %3199 = vmatprep.subr.bf16.mxu0 %v3654_v0 }
0x13be   :  { %3201 = vmatpush3.bf16.msra.mxu0 %v3968_v31 }
0x13bf   :  { %3208 = vmatprep.subr.bf16.mxu0 %v3654_v0 }
0x1484   :  { %v1221_v54 = vpop.f32.mrb[8].mxu0 }
0x1485   :  { %v1226_v55 = vrot.slane %v1221_v54, 1  ;;  %v1227_v56 = vrot.slane %v1221_v54, 2  ;;  %v3017_v57 = vpop.f32.mrb[9].mxu0 }
0x1487   :  { %v1230_v58 = vadd.f32 %v1226_v55, %v3807_v18  ;;  %v1231_v59 = vadd.f32 %v1227_v56, %v3805_v14 }
0x1489   :  { %3362 = vtanh.f32 %v1230_v58  ;;  %v2801_v62 = vmul.f32 -1.442695, %v1230_v58  ;;  %v2802_v63 = vmul.f32 -1.442695, %v1231_v59 }
0x148a   :  { %3364 = vtanh.f32 %v1231_v59 }
0x148b   :  { %3366 = vpow2.f32 %v2801_v62 }
0x148c   :  { %3368 = vpow2.f32 %v2802_v63  ;;  %v1473_v5 = vpop.f32.mrb[10].mxu0 }
0x148d   :  { %v3039_v40 = vpop.f32.mrb[11].mxu0  ;;  %v1478_v43 = vrot.slane %v1473_v5, 1 }
0x1493   :  { %v3363_v60 = vpop.eup %3362 }
0x1494   :  { %v3365_v61 = vpop.eup %3364  ;;  %1256 = vrot.lane.b32.xlu1 %v3363_v60, %s3657_s23 }
0x1495   :  { %1258 = vrot.lane.b32.xlu0 %v3365_v61, %s3657_s23  ;;  %v3367_v2 = vpop.eup %3366 }
0x1496   :  { %v3369_v3 = vpop.eup %3368  ;;  %v1238_v4 = vadd.f32 1.0, %v3367_v2 }
0x1497   :  { %v1239_v6 = vadd.f32 1.0, %v3369_v3 }
0x1498   :  { %3370 = vrcp.f32 %v1238_v4 }
0x1499   :  { %3372 = vrcp.f32 %v1239_v6 }
0x14a2   :  { %v3371_v18 = vpop.eup %3370 }
0x14a3   :  { %v3373_v7 = vpop.eup %3372  ;;  %v1252_v12 = vmul.f32 %v3371_v18, %v1248_v44 }
0x14a4   :  { %v1253_v13 = vmul.f32 %v3373_v7, %v1249_v47 }
0x1506   :  { %v1257_v14 = vpop.permute.xlu1 %1256 }
0x1507   :  { %v1259_v8 = vpop.permute.xlu0 %1258  ;;  %v1262_v9 = vmul.f32 %v3371_v18, %v1257_v14 }
0x1508   :  { %v1263_v11 = vmul.f32 %v3373_v7, %v1259_v8 }
0x1509   :  { %1266 = vrot.lane.b32.xlu1 %v1262_v9, %s3658_s3 }
0x150a   :  { %1268 = vrot.lane.b32.xlu0 %v1263_v11, %s3658_s3 }
0x157b   :  { %v1267_v15 = vpop.permute.xlu1 %1266 }
0x157c   :  { %v1269_v16 = vpop.permute.xlu0 %1268  ;;  %v1272_v17 = vadd.f32 %v1267_v15, %v1252_v12 }
0x157d   :  { %v1273_v19 = vadd.f32 %v1269_v16, %v1253_v13 }
0x157e   :  { %3374 = vtanh.f32 %v1272_v17 }
0x157f   :  { %3376 = vtanh.f32 %v1273_v19 }
0x1588   :  { %v3375_v32 = vpop.eup %3374 }
0x1589   :  { %v3377_v33 = vpop.eup %3376  ;;  %1278 = vrot.lane.b32.xlu1 %v3375_v32, %s3657_s23 }
0x158a   :  { %1280 = vrot.lane.b32.xlu0 %v3377_v33, %s3657_s23 }
0x15fb   :  { %v1279_v34 = vpop.permute.xlu1 %1278 }
0x15fc   :  { %v1281_v35 = vpop.permute.xlu0 %1280  ;;  %v3983_v36 = vmul.f32 %v3371_v18, %v1279_v34 }
0x15fd   :  { %v3985_v37 = vmul.f32 %v3373_v7, %v1281_v35 }
0x15fe   :  { %v1305_v38 = vsel %vm1304_vm10, %v3938_v49, %v3983_v36 }
0x15ff   :  { %v1306_v39 = vsel %vm1304_vm10, %v3940_v51, %v3985_v37  ;;  %1320 = vrot.lane.b32.xlu1 %v1305_v38, %s3658_s3 }
0x1600   :  { %1322 = vrot.lane.b32.xlu0 %v1306_v39, %s3658_s3 }
0x1671   :  { %v1321_v41 = vpop.permute.xlu1 %1320 }
0x1672   :  { %v1323_v10 = vpop.permute.xlu0 %1322  ;;  %3026 = vmatprep.mubr.msk.f32.mxu1 %vm180_vm3, %v1321_v41 }
0x1673   :  { %3027 = vmatmul.mubr.msk.f32.vlgmr.msra.gmra.mrb[8].mxu1 %vm180_vm3, %v1323_v10 }
0x1674   :  { %3192 = vmatpush3.bf16.msra.mxu1 %v3965_v27  ;;  %3048 = vmatprep.mubr.msk.f32.mxu1 %vm3655_vm0, %v3656_v1 }
0x1675   :  { %3193 = vmatprep.subr.bf16.mxu1 %v3654_v0 }
0x1678   :  { %3195 = vmatpush3.bf16.msra.mxu1 %v3968_v31 }
0x1679   :  { %3202 = vmatprep.subr.bf16.mxu1 %v3654_v0 }
0x1746   :  { %v3028_v45 = vpop.f32.mrb[8].mxu1 }
0x1747   :  { %v4004_v46 = vadd.f32 %v3028_v45, %v2803_v42  ;;  %v1394_v48 = vpop.f32.mrb[9].mxu1 }
0x1748   :  { %v4006_v49 = vadd.f32 %v2803_v42, %v1394_v48 }
0x1749   :  { %v1482_v50 = vadd.f32 %v1478_v43, %v4004_v46 }
0x174a   :  { %v1481_v51 = vadd.f32 %v1473_v5, %v4006_v49 }
0x174b   :  { %3378 = vtanh.f32 %v1482_v50  ;;  %v2807_v54 = vmul.f32 -1.442695, %v1482_v50 }
0x174c   :  { %3380 = vtanh.f32 %v1481_v51  ;;  %v2806_v55 = vmul.f32 -1.442695, %v1481_v51 }
0x174d   :  { %3382 = vpow2.f32 %v2807_v54 }
0x174e   :  { %3384 = vpow2.f32 %v2806_v55 }
0x1755   :  { %v3379_v52 = vpop.eup %3378 }
0x1756   :  { %v3381_v53 = vpop.eup %3380  ;;  %1503 = vrot.lane.b32.xlu1 %v3379_v52, %s3657_s23 }
0x1757   :  { %1501 = vrot.lane.b32.xlu0 %v3381_v53, %s3657_s23  ;;  %v3383_v56 = vpop.eup %3382 }
0x1758   :  { %v3385_v57 = vpop.eup %3384  ;;  %v1490_v58 = vadd.f32 1.0, %v3383_v56 }
0x1759   :  { %v1489_v59 = vadd.f32 1.0, %v3385_v57 }
0x175a   :  { %3386 = vrcp.f32 %v1490_v58 }
0x175b   :  { %3388 = vrcp.f32 %v1489_v59 }
0x1764   :  { %v3387_v60 = vpop.eup %3386 }
0x1765   :  { %v3389_v62 = vpop.eup %3388  ;;  %v1498_v4 = vmul.f32 0.0, %v3387_v60 }
0x1766   :  { %v1497_v18 = vmul.f32 0.0, %v3389_v62 }
0x17c8   :  { %v1504_v61 = vpop.permute.xlu1 %1503 }
0x17c9   :  { %v1508_v63 = vmul.f32 %v3387_v60, %v1504_v61  ;;  %v1502_v2 = vpop.permute.xlu0 %1501 }
0x17ca   :  { %v1507_v3 = vmul.f32 %v3389_v62, %v1502_v2 }
0x17cb   :  { %1513 = vrot.lane.b32.xlu1 %v1508_v63, %s3658_s3 }
0x17cc   :  { %1511 = vrot.lane.b32.xlu0 %v1507_v3, %s3658_s3 }
0x183d   :  { %v1514_v6 = vpop.permute.xlu1 %1513 }
0x183e   :  { %v1518_v14 = vadd.f32 %v1514_v6, %v1498_v4  ;;  %v1512_v7 = vpop.permute.xlu0 %1511 }
0x183f   :  { %v1517_v8 = vadd.f32 %v1512_v7, %v1497_v18 }
0x1840   :  { %3390 = vtanh.f32 %v1518_v14  ;;  %v1632_v41 = vrot.slane %v1518_v14, 7 }
0x1841   :  { %3392 = vtanh.f32 %v1517_v8  ;;  %v1631_v42 = vrot.slane %v1517_v8, 7 }
0x184a   :  { %v3391_v9 = vpop.eup %3390 }
0x184b   :  { %v3393_v11 = vpop.eup %3392  ;;  %1525 = vrot.lane.b32.xlu1 %v3391_v9, %s3657_s23 }
0x184c   :  { %1523 = vrot.lane.b32.xlu0 %v3393_v11, %s3657_s23 }
0x18bd   :  { %v1526_v44 = vpop.permute.xlu1 %1525 }
0x18be   :  { %v1530_v47 = vmul.f32 %v3387_v60, %v1526_v44  ;;  %v1524_v12 = vpop.permute.xlu0 %1523 }
0x18bf   :  { %v1529_v13 = vmul.f32 %v3389_v62, %v1524_v12 }
0x18c0   :  { %v1533_v15 = vrot.slane %v1530_v47, 7 }
0x18c2   :  { %v1534_v16 = vsel %vm311_vm2, %v1533_v15, %v1529_v13 }
0x18c3   :  { %1535 = vrot.lane.b32.xlu1 %v1534_v16, %s3658_s3 }
0x1935   :  { %v1536_v17 = vpop.permute.xlu1 %1535 }
0x1936   :  { %3049 = vmatmul.mubr.msk.f32.vlgmr.msra.gmra.mrb[10].mxu1 %vm180_vm3, %v1536_v17 }
0x1937   :  { %3204 = vmatpush3.bf16.msra.mxu1 %v3965_v27  ;;  %3070 = vmatprep.mubr.msk.f32.mxu1 %vm3655_vm0, %v3656_v1 }
0x1938   :  { %3205 = vmatprep.subr.bf16.mxu1 %v3654_v0 }
0x193b   :  { %3207 = vmatpush3.bf16.msra.mxu1 %v3968_v31 }
0x193c   :  { %3214 = vmatprep.subr.bf16.mxu1 %v3654_v0 }
0x1a09   :  { %v1605_v19 = vpop.f32.mrb[10].mxu1 }
0x1a0a   :  { %v1610_v20 = vrot.slane %v1605_v19, 7  ;;  %v1614_v21 = vadd.f32 %v1605_v19, %v4004_v46  ;;  %v3050_v22 = vpop.f32.mrb[11].mxu1 }
0x1a0c   :  { %v1613_v23 = vadd.f32 %v1610_v20, %v4006_v49  ;;  %3394 = vtanh.f32 %v1614_v21  ;;  %v2810_v26 = vmul.f32 -1.442695, %v1614_v21 }
0x1a0e   :  { %3396 = vtanh.f32 %v1613_v23  ;;  %v2809_v28 = vmul.f32 -1.442695, %v1613_v23 }
0x1a0f   :  { %3398 = vpow2.f32 %v2810_v26 }
0x1a10   :  { %3400 = vpow2.f32 %v2809_v28 }
0x1a16   :  { %v3395_v24 = vpop.eup %3394 }
0x1a17   :  { %1641 = vrot.lane.b32.xlu1 %v3395_v24, %s3657_s23 }
0x1a18   :  { %v3397_v25 = vpop.eup %3396 }
0x1a19   :  { %1639 = vrot.lane.b32.xlu0 %v3397_v25, %s3657_s23  ;;  %v3399_v29 = vpop.eup %3398 }
0x1a1a   :  { %v3401_v30 = vpop.eup %3400  ;;  %v1622_v32 = vadd.f32 1.0, %v3399_v29 }
0x1a1b   :  { %v1621_v33 = vadd.f32 1.0, %v3401_v30 }
0x1a1c   :  { %3402 = vrcp.f32 %v1622_v32 }
0x1a1d   :  { %3404 = vrcp.f32 %v1621_v33 }
0x1a26   :  { %v3403_v34 = vpop.eup %3402 }
0x1a27   :  { %v3405_v39 = vpop.eup %3404  ;;  %v1636_v10 = vmul.f32 %v3403_v34, %v1632_v41 }
0x1a28   :  { %v1635_v48 = vmul.f32 %v3405_v39, %v1631_v42 }
0x1a89   :  { %v1642_v35 = vpop.permute.xlu1 %1641 }
0x1a8a   :  { %v1646_v38 = vmul.f32 %v3403_v34, %v1642_v35 }
0x1a8b   :  { %v1640_v5 = vpop.permute.xlu0 %1639 }
0x1a8c   :  { %1651 = vrot.lane.b32.xlu1 %v1646_v38, %s3658_s3  ;;  %v1645_v40 = vmul.f32 %v3405_v39, %v1640_v5 }
0x1a8e   :  { %1649 = vrot.lane.b32.xlu0 %v1645_v40, %s3658_s3 }
0x1afe   :  { %v1652_v43 = vpop.permute.xlu1 %1651 }
0x1aff   :  { %v1656_v45 = vadd.f32 %v1652_v43, %v1636_v10 }
0x1b00   :  { %v1650_v50 = vpop.permute.xlu0 %1649 }
0x1b01   :  { %3406 = vtanh.f32 %v1656_v45  ;;  %v1655_v51 = vadd.f32 %v1650_v50, %v1635_v48  ;;  %v1771_v20 = vrot.slane %v1656_v45, 7 }
0x1b03   :  { %3408 = vtanh.f32 %v1655_v51  ;;  %v1770_v19 = vrot.slane %v1655_v51, 7 }
0x1b0b   :  { %v3407_v52 = vpop.eup %3406 }
0x1b0c   :  { %1663 = vrot.lane.b32.xlu1 %v3407_v52, %s3657_s23 }
0x1b0d   :  { %v3409_v53 = vpop.eup %3408 }
0x1b0e   :  { %1661 = vrot.lane.b32.xlu0 %v3409_v53, %s3657_s23 }
0x1b7e   :  { %v1664_v54 = vpop.permute.xlu1 %1663 }
0x1b7f   :  { %v1668_v57 = vmul.f32 %v3403_v34, %v1664_v54 }
0x1b80   :  { %v1662_v55 = vpop.permute.xlu0 %1661 }
0x1b81   :  { %v1667_v56 = vmul.f32 %v3405_v39, %v1662_v55 }
0x1b83   :  { %v1671_v58 = vrot.slane %v1667_v56, 1 }
0x1b85   :  { %v1672_v59 = vsel %vm311_vm2, %v1668_v57, %v1671_v58 }
0x1b86   :  { %1673 = vrot.lane.b32.xlu0 %v1672_v59, %s3658_s3 }
0x1bf8   :  { %v1674_v60 = vpop.permute.xlu0 %1673 }
0x1bf9   :  { %3060 = vmatmul.mubr.msk.f32.vlgmr.msra.gmra.mrb[12].mxu0 %vm180_vm3, %v1674_v60 }
0x1bfa   :  { %3210 = vmatpush3.bf16.msra.mxu0 %v3965_v27  ;;  %3081 = vmatprep.mubr.msk.f32.mxu0 %vm3655_vm0, %v3656_v1 }
0x1bfb   :  { %3211 = vmatprep.subr.bf16.mxu0 %v3654_v0 }
0x1bfe   :  { %3213 = vmatpush3.bf16.msra.mxu0 %v3968_v31 }
0x1bff   :  { %3220 = vmatprep.subr.bf16.mxu0 %v3654_v0 }
0x1ccc   :  { %v1743_v61 = vpop.f32.mrb[12].mxu0 }
0x1ccd   :  { %v1748_v62 = vrot.slane %v1743_v61, 6  ;;  %v1749_v63 = vrot.slane %v1743_v61, 7  ;;  %v3061_v2 = vpop.f32.mrb[13].mxu0 }
0x1ccf   :  { %v1752_v3 = vadd.f32 %v1748_v62, %v4006_v49  ;;  %v1753_v4 = vadd.f32 %v1749_v63, %v4004_v46 }
0x1cd1   :  { %3410 = vtanh.f32 %v1752_v3  ;;  %v2812_v14 = vmul.f32 -1.442695, %v1752_v3  ;;  %v2813_v7 = vmul.f32 -1.442695, %v1753_v4 }
0x1cd2   :  { %3412 = vtanh.f32 %v1753_v4 }
0x1cd3   :  { %3414 = vpow2.f32 %v2812_v14 }
0x1cd4   :  { %3416 = vpow2.f32 %v2813_v7 }
0x1cdb   :  { %v3411_v6 = vpop.eup %3410 }
0x1cdc   :  { %v3413_v18 = vpop.eup %3412  ;;  %1778 = vrot.lane.b32.xlu1 %v3411_v6, %s3657_s23 }
0x1cdd   :  { %1780 = vrot.lane.b32.xlu0 %v3413_v18, %s3657_s23  ;;  %v3415_v8 = vpop.eup %3414 }
0x1cde   :  { %v3417_v9 = vpop.eup %3416  ;;  %v1760_v11 = vadd.f32 1.0, %v3415_v8 }
0x1cdf   :  { %v1761_v44 = vadd.f32 1.0, %v3417_v9 }
0x1ce0   :  { %3418 = vrcp.f32 %v1760_v11 }
0x1ce1   :  { %3420 = vrcp.f32 %v1761_v44 }
0x1cea   :  { %v3419_v47 = vpop.eup %3418 }
0x1ceb   :  { %v3421_v13 = vpop.eup %3420  ;;  %v1774_v21 = vmul.f32 %v3419_v47, %v1770_v19 }
0x1cec   :  { %v1775_v22 = vmul.f32 %v3421_v13, %v1771_v20 }
0x1d4e   :  { %v1779_v12 = vpop.permute.xlu1 %1778 }
0x1d4f   :  { %v1781_v15 = vpop.permute.xlu0 %1780  ;;  %v1784_v16 = vmul.f32 %v3419_v47, %v1779_v12 }
0x1d50   :  { %v1785_v17 = vmul.f32 %v3421_v13, %v1781_v15 }
0x1d51   :  { %1788 = vrot.lane.b32.xlu1 %v1784_v16, %s3658_s3 }
0x1d52   :  { %1790 = vrot.lane.b32.xlu0 %v1785_v17, %s3658_s3 }
0x1dc3   :  { %v1789_v23 = vpop.permute.xlu1 %1788 }
0x1dc4   :  { %v1791_v24 = vpop.permute.xlu0 %1790  ;;  %v1794_v25 = vadd.f32 %v1789_v23, %v1774_v21 }
0x1dc5   :  { %v1795_v26 = vadd.f32 %v1791_v24, %v1775_v22 }
0x1dc6   :  { %3422 = vtanh.f32 %v1794_v25  ;;  %v1910_v63 = vrot.slane %v1794_v25, 7 }
0x1dc7   :  { %3424 = vtanh.f32 %v1795_v26  ;;  %v1911_v2 = vrot.slane %v1795_v26, 7 }
0x1dd0   :  { %v3423_v28 = vpop.eup %3422 }
0x1dd1   :  { %v3425_v29 = vpop.eup %3424  ;;  %1800 = vrot.lane.b32.xlu1 %v3423_v28, %s3657_s23 }
0x1dd2   :  { %1802 = vrot.lane.b32.xlu0 %v3425_v29, %s3657_s23 }
0x1e43   :  { %v1801_v30 = vpop.permute.xlu1 %1800 }
0x1e44   :  { %v1803_v32 = vpop.permute.xlu0 %1802  ;;  %v1806_v33 = vmul.f32 %v3419_v47, %v1801_v30 }
0x1e45   :  { %v1807_v34 = vmul.f32 %v3421_v13, %v1803_v32 }
0x1e46   :  { %v1810_v35 = vrot.slane %v1806_v33, 2 }
0x1e47   :  { %v1811_v38 = vrot.slane %v1807_v34, 1 }
0x1e49   :  { %v1812_v39 = vsel %vm311_vm2, %v1811_v38, %v1810_v35 }
0x1e4a   :  { %1813 = vrot.lane.b32.xlu1 %v1812_v39, %s3658_s3 }
0x1ebc   :  { %v1814_v5 = vpop.permute.xlu1 %1813 }
0x1ebd   :  { %3071 = vmatmul.mubr.msk.f32.vlgmr.msra.gmra.mrb[12].mxu1 %vm180_vm3, %v1814_v5 }
0x1ebe   :  { %3216 = vmatpush3.bf16.msra.mxu1 %v3965_v27  ;;  %3092 = vmatprep.mubr.msk.f32.mxu1 %vm3655_vm0, %v3656_v1 }
0x1ebf   :  { %3217 = vmatprep.subr.bf16.mxu1 %v3654_v0 }
0x1ec2   :  { %3219 = vmatpush3.bf16.msra.mxu1 %v3968_v31 }
0x1ec3   :  { %3226 = vmatprep.subr.bf16.mxu1 %v3654_v0 }
0x1f90   :  { %v1883_v40 = vpop.f32.mrb[12].mxu1 }
0x1f91   :  { %v1888_v41 = vrot.slane %v1883_v40, 5  ;;  %v1889_v10 = vrot.slane %v1883_v40, 6  ;;  %v3072_v42 = vpop.f32.mrb[13].mxu1 }
0x1f93   :  { %v1892_v43 = vadd.f32 %v1888_v41, %v4006_v49  ;;  %v1893_v45 = vadd.f32 %v1889_v10, %v4004_v46 }
0x1f95   :  { %3426 = vtanh.f32 %v1892_v43  ;;  %v2815_v51 = vmul.f32 -1.442695, %v1892_v43  ;;  %v2816_v52 = vmul.f32 -1.442695, %v1893_v45 }
0x1f96   :  { %3428 = vtanh.f32 %v1893_v45 }
0x1f97   :  { %3430 = vpow2.f32 %v2815_v51 }
0x1f98   :  { %3432 = vpow2.f32 %v2816_v52 }
0x1f9f   :  { %v3427_v48 = vpop.eup %3426 }
0x1fa0   :  { %v3429_v50 = vpop.eup %3428  ;;  %1918 = vrot.lane.b32.xlu0 %v3427_v48, %s3657_s23 }
0x1fa1   :  { %1920 = vrot.lane.b32.xlu1 %v3429_v50, %s3657_s23  ;;  %v3431_v53 = vpop.eup %3430 }
0x1fa2   :  { %v3433_v54 = vpop.eup %3432  ;;  %v1900_v55 = vadd.f32 1.0, %v3431_v53 }
0x1fa3   :  { %v1901_v56 = vadd.f32 1.0, %v3433_v54 }
0x1fa4   :  { %3434 = vrcp.f32 %v1900_v55 }
0x1fa5   :  { %3436 = vrcp.f32 %v1901_v56 }
0x1fae   :  { %v3435_v57 = vpop.eup %3434 }
0x1faf   :  { %v3437_v59 = vpop.eup %3436  ;;  %v1914_v3 = vmul.f32 %v3435_v57, %v1910_v63 }
0x1fb0   :  { %v1915_v4 = vmul.f32 %v3437_v59, %v1911_v2 }
0x2012   :  { %v1919_v58 = vpop.permute.xlu0 %1918 }
0x2013   :  { %v1921_v60 = vpop.permute.xlu1 %1920  ;;  %v1924_v61 = vmul.f32 %v3435_v57, %v1919_v58 }
0x2014   :  { %v1925_v62 = vmul.f32 %v3437_v59, %v1921_v60 }
0x2015   :  { %1928 = vrot.lane.b32.xlu0 %v1924_v61, %s3658_s3 }
0x2016   :  { %1930 = vrot.lane.b32.xlu1 %v1925_v62, %s3658_s3 }
0x2087   :  { %v1929_v6 = vpop.permute.xlu0 %1928 }
0x2088   :  { %v1931_v18 = vpop.permute.xlu1 %1930  ;;  %v1934_v14 = vadd.f32 %v1929_v6, %v1914_v3 }
0x2089   :  { %v1935_v7 = vadd.f32 %v1931_v18, %v1915_v4 }
0x208a   :  { %3438 = vtanh.f32 %v1934_v14  ;;  %v2050_v10 = vrot.slane %v1934_v14, 7 }
0x208b   :  { %3440 = vtanh.f32 %v1935_v7  ;;  %v2051_v42 = vrot.slane %v1935_v7, 7 }
0x2094   :  { %v3439_v8 = vpop.eup %3438 }
0x2095   :  { %v3441_v9 = vpop.eup %3440  ;;  %1940 = vrot.lane.b32.xlu0 %v3439_v8, %s3657_s23 }
0x2096   :  { %1942 = vrot.lane.b32.xlu1 %v3441_v9, %s3657_s23 }
0x2107   :  { %v1941_v11 = vpop.permute.xlu0 %1940 }
0x2108   :  { %v1943_v44 = vpop.permute.xlu1 %1942  ;;  %v1946_v47 = vmul.f32 %v3435_v57, %v1941_v11 }
0x2109   :  { %v1947_v12 = vmul.f32 %v3437_v59, %v1943_v44 }
0x210a   :  { %v1950_v13 = vrot.slane %v1946_v47, 3 }
0x210b   :  { %v1951_v15 = vrot.slane %v1947_v12, 2 }
0x210d   :  { %v1952_v16 = vsel %vm311_vm2, %v1951_v15, %v1950_v13 }
0x210e   :  { %1953 = vrot.lane.b32.xlu0 %v1952_v16, %s3658_s3 }
0x2180   :  { %v1954_v17 = vpop.permute.xlu0 %1953 }
0x2181   :  { %3082 = vmatmul.mubr.msk.f32.vlgmr.msra.gmra.mrb[14].mxu0 %vm180_vm3, %v1954_v17 }
0x2182   :  { %3222 = vmatpush3.bf16.msra.mxu0 %v3965_v27  ;;  %3103 = vmatprep.mubr.msk.f32.mxu0 %vm3655_vm0, %v3656_v1 }
0x2183   :  { %3223 = vmatprep.subr.bf16.mxu0 %v3654_v0 }
0x2186   :  { %3225 = vmatpush3.bf16.msra.mxu0 %v3968_v31 }
0x2187   :  { %3232 = vmatprep.subr.bf16.mxu0 %v3654_v0 }
0x2254   :  { %v2023_v19 = vpop.f32.mrb[14].mxu0 }
0x2255   :  { %v2028_v20 = vrot.slane %v2023_v19, 4  ;;  %v2029_v21 = vrot.slane %v2023_v19, 5  ;;  %v3083_v22 = vpop.f32.mrb[15].mxu0 }
0x2257   :  { %v2032_v23 = vadd.f32 %v2028_v20, %v4006_v49  ;;  %v2033_v24 = vadd.f32 %v2029_v21, %v4004_v46 }
0x2259   :  { %3442 = vtanh.f32 %v2032_v23  ;;  %v2818_v28 = vmul.f32 -1.442695, %v2032_v23  ;;  %v2819_v29 = vmul.f32 -1.442695, %v2033_v24 }
0x225a   :  { %3444 = vtanh.f32 %v2033_v24 }
0x225b   :  { %3446 = vpow2.f32 %v2818_v28 }
0x225c   :  { %3448 = vpow2.f32 %v2819_v29 }
0x2263   :  { %v3443_v25 = vpop.eup %3442 }
0x2264   :  { %v3445_v26 = vpop.eup %3444  ;;  %2058 = vrot.lane.b32.xlu1 %v3443_v25, %s3657_s23 }
0x2265   :  { %2060 = vrot.lane.b32.xlu0 %v3445_v26, %s3657_s23  ;;  %v3447_v30 = vpop.eup %3446 }
0x2266   :  { %v3449_v32 = vpop.eup %3448  ;;  %v2040_v33 = vadd.f32 1.0, %v3447_v30 }
0x2267   :  { %v2041_v34 = vadd.f32 1.0, %v3449_v32 }
0x2268   :  { %3450 = vrcp.f32 %v2040_v33 }
0x2269   :  { %3452 = vrcp.f32 %v2041_v34 }
0x2272   :  { %v3451_v35 = vpop.eup %3450 }
0x2273   :  { %v3453_v39 = vpop.eup %3452  ;;  %v2054_v43 = vmul.f32 %v3451_v35, %v2050_v10 }
0x2274   :  { %v2055_v45 = vmul.f32 %v3453_v39, %v2051_v42 }
0x22d6   :  { %v2059_v38 = vpop.permute.xlu1 %2058 }
0x22d7   :  { %v2061_v5 = vpop.permute.xlu0 %2060  ;;  %v2064_v40 = vmul.f32 %v3451_v35, %v2059_v38 }
0x22d8   :  { %v2065_v41 = vmul.f32 %v3453_v39, %v2061_v5 }
0x22d9   :  { %2068 = vrot.lane.b32.xlu1 %v2064_v40, %s3658_s3 }
0x22da   :  { %2070 = vrot.lane.b32.xlu0 %v2065_v41, %s3658_s3 }
0x234b   :  { %v2069_v48 = vpop.permute.xlu1 %2068 }
0x234c   :  { %v2071_v50 = vpop.permute.xlu0 %2070  ;;  %v2074_v51 = vadd.f32 %v2069_v48, %v2054_v43 }
0x234d   :  { %v2075_v52 = vadd.f32 %v2071_v50, %v2055_v45 }
0x234e   :  { %3454 = vtanh.f32 %v2074_v51  ;;  %v2190_v19 = vrot.slane %v2074_v51, 7 }
0x234f   :  { %3456 = vtanh.f32 %v2075_v52  ;;  %v2191_v20 = vrot.slane %v2075_v52, 7 }
0x2358   :  { %v3455_v53 = vpop.eup %3454 }
0x2359   :  { %v3457_v54 = vpop.eup %3456  ;;  %2080 = vrot.lane.b32.xlu1 %v3455_v53, %s3657_s23 }
0x235a   :  { %2082 = vrot.lane.b32.xlu0 %v3457_v54, %s3657_s23 }
0x23cb   :  { %v2081_v55 = vpop.permute.xlu1 %2080 }
0x23cc   :  { %v2083_v56 = vpop.permute.xlu0 %2082  ;;  %v2086_v57 = vmul.f32 %v3451_v35, %v2081_v55 }
0x23cd   :  { %v2087_v58 = vmul.f32 %v3453_v39, %v2083_v56 }
0x23ce   :  { %v2090_v59 = vrot.slane %v2086_v57, 4 }
0x23cf   :  { %v2091_v60 = vrot.slane %v2087_v58, 3 }
0x23d1   :  { %v2092_v61 = vsel %vm311_vm2, %v2091_v60, %v2090_v59 }
0x23d2   :  { %2093 = vrot.lane.b32.xlu1 %v2092_v61, %s3658_s3 }
0x2444   :  { %v2094_v62 = vpop.permute.xlu1 %2093 }
0x2445   :  { %3093 = vmatmul.mubr.msk.f32.vlgmr.msra.gmra.mrb[14].mxu1 %vm180_vm3, %v2094_v62 }
0x2446   :  { %3228 = vmatpush3.bf16.msra.mxu1 %v3965_v27  ;;  %3114 = vmatprep.mubr.msk.f32.mxu1 %vm3655_vm0, %v3656_v1 }
0x2447   :  { %3229 = vmatprep.subr.bf16.mxu1 %v3654_v0 }
0x244a   :  { %3231 = vmatpush3.bf16.msra.mxu1 %v3968_v31 }
0x2518   :  { %v2163_v63 = vpop.f32.mrb[14].mxu1 }
0x2519   :  { %v2168_v2 = vrot.slane %v2163_v63, 3  ;;  %v2169_v3 = vrot.slane %v2163_v63, 4  ;;  %v3094_v4 = vpop.f32.mrb[15].mxu1 }
0x251b   :  { %v2172_v6 = vadd.f32 %v2168_v2, %v4006_v49  ;;  %v2173_v18 = vadd.f32 %v2169_v3, %v4004_v46 }
0x251d   :  { %3458 = vtanh.f32 %v2172_v6  ;;  %v2821_v27 = vmul.f32 -1.442695, %v2172_v6  ;;  %v2822_v8 = vmul.f32 -1.442695, %v2173_v18 }
0x251e   :  { %3460 = vtanh.f32 %v2173_v18 }
0x251f   :  { %3462 = vpow2.f32 %v2821_v27 }
0x2520   :  { %3464 = vpow2.f32 %v2822_v8 }
0x2527   :  { %v3459_v14 = vpop.eup %3458 }
0x2528   :  { %v3461_v7 = vpop.eup %3460  ;;  %2198 = vrot.lane.b32.xlu0 %v3459_v14, %s3657_s23 }
0x2529   :  { %2200 = vrot.lane.b32.xlu1 %v3461_v7, %s3657_s23  ;;  %v3463_v31 = vpop.eup %3462 }
0x252a   :  { %v3465_v9 = vpop.eup %3464  ;;  %v2180_v11 = vadd.f32 1.0, %v3463_v31 }
0x252b   :  { %v2181_v44 = vadd.f32 1.0, %v3465_v9 }
0x252c   :  { %3466 = vrcp.f32 %v2180_v11 }
0x252d   :  { %3468 = vrcp.f32 %v2181_v44 }
0x2536   :  { %v3467_v47 = vpop.eup %3466 }
0x2537   :  { %v3469_v13 = vpop.eup %3468  ;;  %v2194_v21 = vmul.f32 %v3467_v47, %v2190_v19 }
0x2538   :  { %v2195_v22 = vmul.f32 %v3469_v13, %v2191_v20 }
0x259a   :  { %v2199_v12 = vpop.permute.xlu0 %2198 }
0x259b   :  { %v2201_v15 = vpop.permute.xlu1 %2200  ;;  %v2204_v16 = vmul.f32 %v3467_v47, %v2199_v12 }
0x259c   :  { %v2205_v17 = vmul.f32 %v3469_v13, %v2201_v15 }
0x259d   :  { %2208 = vrot.lane.b32.xlu0 %v2204_v16, %s3658_s3 }
0x259e   :  { %2210 = vrot.lane.b32.xlu1 %v2205_v17, %s3658_s3 }
0x260f   :  { %v2209_v23 = vpop.permute.xlu0 %2208 }
0x2610   :  { %v2211_v24 = vpop.permute.xlu1 %2210  ;;  %v2214_v25 = vadd.f32 %v2209_v23, %v2194_v21 }
0x2611   :  { %v2215_v26 = vadd.f32 %v2211_v24, %v2195_v22 }
0x2612   :  { %3470 = vtanh.f32 %v2214_v25  ;;  %v2330_v62 = vrot.slane %v2214_v25, 7 }
0x2613   :  { %3472 = vtanh.f32 %v2215_v26  ;;  %v2331_v63 = vrot.slane %v2215_v26, 7 }
0x261c   :  { %v3471_v28 = vpop.eup %3470 }
0x261d   :  { %v3473_v29 = vpop.eup %3472  ;;  %2220 = vrot.lane.b32.xlu0 %v3471_v28, %s3657_s23 }
0x261e   :  { %2222 = vrot.lane.b32.xlu1 %v3473_v29, %s3657_s23 }
0x268f   :  { %v2221_v30 = vpop.permute.xlu0 %2220 }
0x2690   :  { %v2223_v32 = vpop.permute.xlu1 %2222  ;;  %v2226_v33 = vmul.f32 %v3467_v47, %v2221_v30 }
0x2691   :  { %v2227_v34 = vmul.f32 %v3469_v13, %v2223_v32 }
0x2692   :  { %v2230_v35 = vrot.slane %v2226_v33, 5 }
0x2693   :  { %v2231_v38 = vrot.slane %v2227_v34, 4 }
0x2695   :  { %v2232_v39 = vsel %vm311_vm2, %v2231_v38, %v2230_v35 }
0x2696   :  { %2233 = vrot.lane.b32.xlu0 %v2232_v39, %s3658_s3 }
0x2708   :  { %v2234_v5 = vpop.permute.xlu0 %2233 }
0x2709   :  { %3104 = vmatmul.mubr.msk.f32.vlgmr.msra.gmra.mrb[16].mxu0 %vm180_vm3, %v2234_v5 }
0x270a   :  { %3125 = vmatprep.mubr.msk.f32.mxu0 %vm3655_vm0, %v3656_v1 }
0x27dc   :  { %v2303_v40 = vpop.f32.mrb[16].mxu0 }
0x27dd   :  { %v2308_v41 = vrot.slane %v2303_v40, 2  ;;  %v2309_v10 = vrot.slane %v2303_v40, 3  ;;  %v3105_v42 = vpop.f32.mrb[17].mxu0 }
0x27df   :  { %v2312_v43 = vadd.f32 %v2308_v41, %v4006_v49  ;;  %v2313_v45 = vadd.f32 %v2309_v10, %v4004_v46 }
0x27e1   :  { %3474 = vtanh.f32 %v2312_v43  ;;  %v2824_v51 = vmul.f32 -1.442695, %v2312_v43  ;;  %v2825_v52 = vmul.f32 -1.442695, %v2313_v45 }
0x27e2   :  { %3476 = vtanh.f32 %v2313_v45  ;;  %v2509_v45 = vmul.f32 0.17677669, %v3985_v37 }
0x27e3   :  { %3478 = vpow2.f32 %v2824_v51  ;;  %v2508_v51 = vmul.f32 0.17677669, %v3983_v36 }
0x27e4   :  { %3480 = vpow2.f32 %v2825_v52 }
0x27eb   :  { %v3475_v48 = vpop.eup %3474 }
0x27ec   :  { %v3477_v50 = vpop.eup %3476  ;;  %2338 = vrot.lane.b32.xlu1 %v3475_v48, %s3657_s23  ;;  %v2513_v48 = vmul.f32 %v2509_v45, %v3985_v37 }
0x27ed   :  { %2340 = vrot.lane.b32.xlu0 %v3477_v50, %s3657_s23  ;;  %v3479_v1 = vpop.eup %3478 }
0x27ee   :  { %v3481_v53 = vpop.eup %3480  ;;  %v2320_v54 = vadd.f32 1.0, %v3479_v1  ;;  %v2516_v1 = vrot.slane %v2513_v48, 7 }
0x27ef   :  { %v2321_v55 = vadd.f32 1.0, %v3481_v53  ;;  %v2512_v53 = vmul.f32 %v2508_v51, %v3983_v36 }
0x27f0   :  { %3482 = vrcp.f32 %v2320_v54 }
0x27f1   :  { %3484 = vrcp.f32 %v2321_v55 }
0x27fa   :  { %v3483_v56 = vpop.eup %3482 }
0x27fb   :  { %v3485_v58 = vpop.eup %3484  ;;  %v2334_v2 = vmul.f32 %v3483_v56, %v2330_v62 }
0x27fc   :  { %v2335_v3 = vmul.f32 %v3485_v58, %v2331_v63 }
0x285e   :  { %v2339_v57 = vpop.permute.xlu1 %2338 }
0x285f   :  { %v2341_v59 = vpop.permute.xlu0 %2340  ;;  %v2344_v60 = vmul.f32 %v3483_v56, %v2339_v57 }
0x2860   :  { %v2345_v61 = vmul.f32 %v3485_v58, %v2341_v59 }
0x2861   :  { %2348 = vrot.lane.b32.xlu1 %v2344_v60, %s3658_s3 }
0x2862   :  { %2350 = vrot.lane.b32.xlu0 %v2345_v61, %s3658_s3 }
0x28d3   :  { %v2349_v4 = vpop.permute.xlu1 %2348 }
0x28d4   :  { %v2351_v6 = vpop.permute.xlu0 %2350  ;;  %v2354_v18 = vadd.f32 %v2349_v4, %v2334_v2 }
0x28d5   :  { %v2355_v14 = vadd.f32 %v2351_v6, %v2335_v3 }
0x28d6   :  { %3486 = vtanh.f32 %v2354_v18  ;;  %v2470_v38 = vrot.slane %v2354_v18, 7 }
0x28d7   :  { %3488 = vtanh.f32 %v2355_v14  ;;  %v2471_v39 = vrot.slane %v2355_v14, 7 }
0x28e0   :  { %v3487_v7 = vpop.eup %3486 }
0x28e1   :  { %v3489_v27 = vpop.eup %3488  ;;  %2360 = vrot.lane.b32.xlu1 %v3487_v7, %s3657_s23 }
0x28e2   :  { %2362 = vrot.lane.b32.xlu0 %v3489_v27, %s3657_s23 }
0x2953   :  { %v2361_v8 = vpop.permute.xlu1 %2360 }
0x2954   :  { %v2363_v31 = vpop.permute.xlu0 %2362  ;;  %v2366_v9 = vmul.f32 %v3483_v56, %v2361_v8 }
0x2955   :  { %v2367_v11 = vmul.f32 %v3485_v58, %v2363_v31 }
0x2956   :  { %v2370_v44 = vrot.slane %v2366_v9, 6 }
0x2957   :  { %v2371_v47 = vrot.slane %v2367_v11, 5 }
0x2959   :  { %v2372_v12 = vsel %vm311_vm2, %v2371_v47, %v2370_v44 }
0x295a   :  { %2373 = vrot.lane.b32.xlu1 %v2372_v12, %s3658_s3 }
0x29cc   :  { %v2374_v13 = vpop.permute.xlu1 %2373 }
0x29cd   :  { %3115 = vmatmul.mubr.msk.f32.vlgmr.msra.gmra.mrb[16].mxu1 %vm180_vm3, %v2374_v13 }
0x2aa0   :  { %v2443_v15 = vpop.f32.mrb[16].mxu1 }
0x2aa1   :  { %v2448_v16 = vrot.slane %v2443_v15, 1  ;;  %v2449_v17 = vrot.slane %v2443_v15, 2  ;;  %v3116_v19 = vpop.f32.mrb[17].mxu1 }
0x2aa3   :  { %v2452_v20 = vadd.f32 %v2448_v16, %v4006_v49  ;;  %v2453_v21 = vadd.f32 %v2449_v17, %v4004_v46 }
0x2aa5   :  { %3490 = vtanh.f32 %v2452_v20  ;;  %v2827_v24 = vmul.f32 -1.442695, %v2452_v20  ;;  %v2828_v25 = vmul.f32 -1.442695, %v2453_v21 }
0x2aa6   :  { %3492 = vtanh.f32 %v2453_v21 }
0x2aa7   :  { %3494 = vpow2.f32 %v2827_v24  ;;  %v2671_v24 = vld [vmem:[%s4186_s7 + $0x8] sm:$0xff] }
0x2aa8   :  { %3496 = vpow2.f32 %v2828_v25 }
0x2aaf   :  { %v3491_v22 = vpop.eup %3490 }
0x2ab0   :  { %v3493_v23 = vpop.eup %3492  ;;  %2478 = vrot.lane.b32.xlu1 %v3491_v22, %s3657_s23  ;;  %v2648_v22 = vrot.slane %v3985_v37, 7 }
0x2ab1   :  { %2480 = vrot.lane.b32.xlu0 %v3493_v23, %s3657_s23  ;;  %v3495_v26 = vpop.eup %3494  ;;  %v2670_v23 = vld [vmem:[%s4186_s7] sm:$0xff] }
0x2ab2   :  { %v3497_v28 = vpop.eup %3496  ;;  %v2460_v29 = vadd.f32 1.0, %v3495_v26  ;;  %v3233_v25 = vpack.c.bf16 %v2671_v24, %v2670_v23 }
0x2ab3   :  { %v2461_v30 = vadd.f32 1.0, %v3497_v28 }
0x2ab4   :  { %3498 = vrcp.f32 %v2460_v29  ;;  %3234 = vmatpush3.bf16.msra.mxu0 %v3233_v25 }
0x2ab5   :  { %3500 = vrcp.f32 %v2461_v30  ;;  %3235 = vmatprep.subr.bf16.mxu0 %v3654_v0 }
0x2abe   :  { %v3499_v49 = vpop.eup %3498 }
0x2abf   :  { %v3501_v32 = vpop.eup %3500  ;;  %v2474_v5 = vmul.f32 %v3499_v49, %v2470_v38 }
0x2ac0   :  { %v2475_v40 = vmul.f32 %v3501_v32, %v2471_v39 }
0x2b22   :  { %v2479_v46 = vpop.permute.xlu1 %2478 }
0x2b23   :  { %v2481_v33 = vpop.permute.xlu0 %2480  ;;  %v2484_v34 = vmul.f32 %v3499_v49, %v2479_v46 }
0x2b24   :  { %v2485_v35 = vmul.f32 %v3501_v32, %v2481_v33 }
0x2b25   :  { %2488 = vrot.lane.b32.xlu1 %v2484_v34, %s3658_s3 }
0x2b26   :  { %2490 = vrot.lane.b32.xlu0 %v2485_v35, %s3658_s3 }
0x2b97   :  { %v2489_v41 = vpop.permute.xlu1 %2488 }
0x2b98   :  { %v2491_v10 = vpop.permute.xlu0 %2490  ;;  %v2494_v42 = vadd.f32 %v2489_v41, %v2474_v5 }
0x2b99   :  { %v2495_v43 = vadd.f32 %v2491_v10, %v2475_v40 }
0x2b9a   :  { %3502 = vtanh.f32 %v2494_v42 }
0x2b9b   :  { %3504 = vtanh.f32 %v2495_v43 }
0x2ba4   :  { %v3503_v50 = vpop.eup %3502 }
0x2ba5   :  { %v3505_v52 = vpop.eup %3504  ;;  %2500 = vrot.lane.b32.xlu1 %v3503_v50, %s3657_s23 }
0x2ba6   :  { %2502 = vrot.lane.b32.xlu0 %v3505_v52, %s3657_s23 }
0x2ba9   :  { %2519 = vrot.lane.b32.xlu1 %v2516_v1, %s3658_s3 }
0x2baa   :  { %2517 = vrot.lane.b32.xlu0 %v2512_v53, %s3658_s3 }
0x2c17   :  { %v2501_v54 = vpop.permute.xlu1 %2500 }
0x2c18   :  { %v2503_v55 = vpop.permute.xlu0 %2502  ;;  %v2506_v56 = vmul.f32 %v3499_v49, %v2501_v54 }
0x2c19   :  { %v2507_v57 = vmul.f32 %v3501_v32, %v2503_v55 }
0x2c1a   :  { %v2510_v58 = vmul.f32 0.17677669, %v2506_v56  ;;  %v2531_v59 = vmul.f32 %v2508_v51, %v2506_v56 }
0x2c1b   :  { %v2511_v60 = vmul.f32 0.17677669, %v2507_v57  ;;  %v2532_v61 = vmul.f32 %v2509_v45, %v2507_v57  ;;  %v2520_v27 = vpop.permute.xlu1 %2519  ;;  %v2659_v21 = vrot.slane %v2507_v57, 7 }
0x2c1c   :  { %2536 = vrot.lane.b32.xlu0 %v2531_v59, %s3658_s3  ;;  %v2548_v2 = vmul.f32 %v2510_v58, %v3983_v36  ;;  %v2565_v6 = vmul.f32 %v2510_v58, %v2506_v56  ;;  %v2518_v14 = vpop.permute.xlu0 %2517  ;;  %v2528_v8 = vsel %vm2527_vm12, %v2520_v27, 0.0 }
0x2c1d   :  { %v2535_v62 = vrot.slane %v2532_v61, 7  ;;  %v2549_v63 = vmul.f32 %v2511_v60, %v3985_v37  ;;  %v2566_v4 = vmul.f32 %v2511_v60, %v2507_v57  ;;  %v2524_v7 = vsel %vm2523_vm11, %v2518_v14, 0.0  ;;  %v2673_v37 = vld [vmem:[%s4186_s7 + $0x18] sm:$0xff] }
0x2c1f   :  { %2538 = vrot.lane.b32.xlu1 %v2535_v62, %s3658_s3  ;;  %v2552_v3 = vrot.slane %v2549_v63, 7  ;;  %v2569_v18 = vrot.slane %v2566_v4, 7 }
0x2c20   :  { %2553 = vrot.lane.b32.xlu0 %v2548_v2, %s3658_s3 }
0x2c23   :  { %2555 = vrot.lane.b32.xlu1 %v2552_v3, %s3658_s3 }
0x2c24   :  { %2570 = vrot.lane.b32.xlu0 %v2565_v6, %s3658_s3 }
0x2c27   :  { %2572 = vrot.lane.b32.xlu1 %v2569_v18, %s3658_s3 }
0x2c43   :  { %2525 = vadd.xlane.f32.xlu0 %v2524_v7 }
0x2c4b   :  { %2529 = vadd.xlane.f32.xlu1 %v2528_v8 }
0x2c8e   :  { %v2537_v31 = vpop.permute.xlu0 %2536 }
0x2c8f   :  { %v2542_v9 = vsel %vm2523_vm11, %v2537_v31, 0.0 }
0x2c90   :  { %2543 = vadd.xlane.f32.xlu0 %v2542_v9 }
0x2c91   :  { %v2539_v11 = vpop.permute.xlu1 %2538 }
0x2c92   :  { %v2554_v44 = vpop.permute.xlu0 %2553  ;;  %v2545_v47 = vsel %vm2527_vm12, %v2539_v11, 0.0 }
0x2c93   :  { %v2559_v12 = vsel %vm2523_vm11, %v2554_v44, 0.0 }
0x2c94   :  { %2560 = vadd.xlane.f32.xlu1 %v2559_v12  ;;  %2546 = vadd.xlane.f32.xlu0 %v2545_v47 }
0x2c95   :  { %v2556_v13 = vpop.permute.xlu1 %2555 }
0x2c96   :  { %v2571_v15 = vpop.permute.xlu0 %2570  ;;  %v2562_v16 = vsel %vm2527_vm12, %v2556_v13, 0.0 }
0x2c97   :  { %v2576_v17 = vsel %vm2523_vm11, %v2571_v15, 0.0 }
0x2c98   :  { %2577 = vadd.xlane.f32.xlu1 %v2576_v17  ;;  %2563 = vadd.xlane.f32.xlu0 %v2562_v16 }
0x2c99   :  { %v2573_v19 = vpop.permute.xlu1 %2572 }
0x2c9a   :  { %v2579_v20 = vsel %vm2527_vm12, %v2573_v19, 0.0 }
0x2c9c   :  { %2580 = vadd.xlane.f32.xlu0 %v2579_v20 }
0x2ca9   :  { %2649 = vrot.lane.b32.xlu1 %v3983_v36, %s3658_s3  ;;  %v2672_v36 = vld [vmem:[%s4186_s7 + $0x10] sm:$0xff]  ;;  %s3659_s7 = smov [#allocation10]  }
0x2caa   :  { %v3236_v26 = vpack.c.bf16 %v2673_v37, %v2672_v36  ;;  %s2766_s15 = sshll.u32 %s3659_s7, 4  ;;  %s2767_s15 = int_to_ptr.vmem [resolvable:$true] %s2766_s15 }
0x2cab   :  { %s3618_s8 = scalar_lea.vmem %s2767_s15, 32  ;;  %p3623_p5 = scmp.lt.s32.totalorder %s2767_s15, %s2767_s15 }
0x2cac   :  { %3237 = vmatpush3.bf16.msra.mxu0 %v3236_v26  ;;  %p3619_p4 = scmp.ne.s32.totalorder %s2767_s15, %s3618_s8  ;;  %p3624_p6 = scmp.lt.s32.totalorder %s3618_s8, %s3618_s8 }
0x2cad   :  { %2660 = vrot.lane.b32.xlu1 %v2506_v56, %s3658_s3 }
0x2cae   :  { %p3625_p7 = por %p3624_p6, %p3623_p5 }
0x2cb0   :  { %p3626_p8 = pnand %p3625_p7, %p3619_p4 }
0x2cb1   :  { %2662 = vrot.lane.b32.xlu1 %v2659_v21, %s3658_s3 }
0x2cb2   :  { %2651 = vrot.lane.b32.xlu0 %v2648_v22, %s3658_s3 }
0x2cd0   :  { %v2526_v28 = vpop.xlane.xlu0 %2525 }
0x2cd8   :  { %v2530_v29 = vpop.xlane.xlu1 %2529 }
0x2d1d   :  { %v2544_v30 = vpop.xlane.xlu0 %2543 }
0x2d1e   :  { %v2582_v49 = vmax.f32 %v2526_v28, %v2544_v30 }
0x2d20   :  { %v2584_v46 = vsub.f32 %v2526_v28, %v2582_v49  ;;  %v2590_v32 = vsub.f32 %v2544_v30, %v2582_v49 }
0x2d21   :  { %v2547_v33 = vpop.xlane.xlu0 %2546  ;;  %v2561_v34 = vpop.xlane.xlu1 %2560 }
0x2d22   :  { %v2586_v35 = vmul.f32 1.442695, %v2584_v46  ;;  %v2592_v0 = vmul.f32 1.442695, %v2590_v32  ;;  %v2583_v38 = vmax.f32 %v2530_v29, %v2547_v33 }
0x2d24   :  { %3506 = vpow2.f32 %v2586_v35  ;;  %v2585_v39 = vsub.f32 %v2530_v29, %v2583_v38  ;;  %v2591_v5 = vsub.f32 %v2547_v33, %v2583_v38 }
0x2d25   :  { %3508 = vpow2.f32 %v2592_v0  ;;  %v2564_v40 = vpop.xlane.xlu0 %2563  ;;  %v2578_v41 = vpop.xlane.xlu1 %2577 }
0x2d26   :  { %v2588_v10 = vmul.f32 1.442695, %v2585_v39  ;;  %v2594_v42 = vmul.f32 1.442695, %v2591_v5  ;;  %v2614_v43 = vmax.f32 %v2561_v34, %v2578_v41 }
0x2d28   :  { %3510 = vpow2.f32 %v2588_v10  ;;  %v2616_v45 = vsub.f32 %v2561_v34, %v2614_v43  ;;  %v2622_v48 = vsub.f32 %v2578_v41, %v2614_v43  ;;  %v2829_v43 = vld [vmem:[#allocation8] ss:$0 sm:$0xff] }
0x2d29   :  { %3512 = vpow2.f32 %v2594_v42  ;;  %v2581_v50 = vpop.xlane.xlu0 %2580  ;;  %v2650_v47 = vpop.permute.xlu1 %2649 }
0x2d2a   :  { %v2618_v51 = vmul.f32 1.442695, %v2616_v45  ;;  %v2624_v52 = vmul.f32 1.442695, %v2622_v48  ;;  %v2615_v1 = vmax.f32 %v2564_v40, %v2581_v50 }
0x2d2c   :  { %3514 = vpow2.f32 %v2618_v51  ;;  %v2617_v53 = vsub.f32 %v2564_v40, %v2615_v1  ;;  %v2623_v54 = vsub.f32 %v2581_v50, %v2615_v1 }
0x2d2d   :  { %3516 = vpow2.f32 %v2624_v52  ;;  %v2661_v25 = vpop.permute.xlu1 %2660  ;;  %v2652_v35 = vpop.permute.xlu0 %2651 }
0x2d2e   :  { %v3507_v55 = vpop.eup %3506  ;;  %v2620_v56 = vmul.f32 1.442695, %v2617_v53  ;;  %v2626_v57 = vmul.f32 1.442695, %v2623_v54 }
0x2d2f   :  { %v3509_v58 = vpop.eup %3508 }
0x2d30   :  { %3518 = vpow2.f32 %v2620_v56  ;;  %v2596_v59 = vadd.f32 %v3509_v58, %v3507_v55 }
0x2d31   :  { %3520 = vpow2.f32 %v2626_v57  ;;  %v2663_v0 = vpop.permute.xlu1 %2662 }
0x2d32   :  { %v3511_v60 = vpop.eup %3510  ;;  %3522 = vrcp.f32 %v2596_v59 }
0x2d33   :  { %v3513_v61 = vpop.eup %3512 }
0x2d34   :  { %v2597_v62 = vadd.f32 %v3513_v61, %v3511_v60 }
0x2d36   :  { %v3515_v63 = vpop.eup %3514  ;;  %3524 = vrcp.f32 %v2597_v62 }
0x2d37   :  { %v3517_v2 = vpop.eup %3516 }
0x2d38   :  { %v2628_v3 = vadd.f32 %v3517_v2, %v3515_v63 }
0x2d3a   :  { %v3519_v4 = vpop.eup %3518  ;;  %3526 = vrcp.f32 %v2628_v3 }
0x2d3b   :  { %v3521_v6 = vpop.eup %3520 }
0x2d3c   :  { %v3523_v18 = vpop.eup %3522  ;;  %v2629_v14 = vadd.f32 %v3521_v6, %v3519_v4 }
0x2d3d   :  { %v2600_v7 = vmul.f32 %v3523_v18, %v2596_v59 }
0x2d3e   :  { %3528 = vrcp.f32 %v2629_v14 }
0x2d3f   :  { %v2602_v8 = vsub.f32 2.0, %v2600_v7 }
0x2d40   :  { %v3525_v27 = vpop.eup %3524 }
0x2d41   :  { %v2601_v31 = vmul.f32 %v3525_v27, %v2597_v62  ;;  %v2604_v44 = vmul.f32 %v3523_v18, %v2602_v8 }
0x2d43   :  { %v2603_v12 = vsub.f32 2.0, %v2601_v31  ;;  %v2606_v19 = vmul.f32 %v3507_v55, %v2604_v44  ;;  %v2610_v23 = vmul.f32 %v3509_v58, %v2604_v44 }
0x2d44   :  { %v3527_v9 = vpop.eup %3526 }
0x2d45   :  { %v2632_v11 = vmul.f32 %v3527_v9, %v2628_v3  ;;  %v2605_v20 = vmul.f32 %v3525_v27, %v2603_v12 }
0x2d47   :  { %v2634_v13 = vsub.f32 2.0, %v2632_v11  ;;  %v2607_v28 = vmul.f32 %v3511_v60, %v2605_v20  ;;  %v2611_v29 = vmul.f32 %v3513_v61, %v2605_v20 }
0x2d48   :  { %v3529_v15 = vpop.eup %3528 }
0x2d49   :  { %v2636_v16 = vmul.f32 %v3527_v9, %v2634_v13  ;;  %v2633_v17 = vmul.f32 %v3529_v15, %v2629_v14 }
0x2d4b   :  { %v2638_v21 = vmul.f32 %v3515_v63, %v2636_v16  ;;  %v2635_v22 = vsub.f32 2.0, %v2633_v17  ;;  %v2642_v24 = vmul.f32 %v3517_v2, %v2636_v16 }
0x2d4d   :  { %v2640_v36 = vadd.f32 %v2638_v21, %v2606_v19  ;;  %v2637_v37 = vmul.f32 %v3529_v15, %v2635_v22  ;;  %v2644_v26 = vadd.f32 %v2642_v24, %v2610_v23 }
0x2d4f   :  { %v2655_v30 = vmul.f32 %v2650_v47, %v2640_v36  ;;  %v2639_v49 = vmul.f32 %v3519_v4, %v2637_v37  ;;  %v2666_v46 = vmul.f32 %v2661_v25, %v2644_v26  ;;  %v2643_v32 = vmul.f32 %v3521_v6, %v2637_v37 }
0x2d51   :  { %v2641_v33 = vadd.f32 %v2639_v49, %v2607_v28  ;;  %v2645_v34 = vadd.f32 %v2643_v32, %v2611_v29  ;;  %v2668_v39 = vadd.f32 %v2666_v46, %v2655_v30 }
0x2d53   :  { %v2656_v38 = vmul.f32 %v2652_v35, %v2641_v33  ;;  %v2667_v5 = vmul.f32 %v2663_v0, %v2645_v34  ;;  %v2683_v41 = vrot.slane %v2668_v39, 7 }
0x2d55   :  { %v2669_v40 = vadd.f32 %v2667_v5, %v2656_v38 }
0x2d57   :  { %v2684_v10 = vrot.slane %v2669_v40, 7 }
0x2d59   :  { %v2685_v42 = vsel %vm1286_vm4, %v2683_v41, %v2684_v10 }
0x2d5a   :  { %3126 = vmatmul.mubr.msk.f32.vlgmr.msra.gmra.mrb[18].mxu0 %vm180_vm3, %v2685_v42 }
0x2e2d   :  { %v2754_v45 = vpop.f32.mrb[18].mxu0 }
0x2e2e   :  { %v2755_v48 = vadd.f32 %v2829_v43, %v2754_v45  ;;  %v3127_v50 = vpop.f32.mrb[19].mxu0 }
0x2e30   :  { %2759 = vst.msk [vmem:[#allocation10] sm:$0x3] %vm2758_vm13, %v2755_v48 }
0x2e31   :  { %3629 = shalt.err (!%p3626_p8)
}
0x2e32   :  { %s3630_s19 = scalar_lea.hbm %s4188_s9, 32 }
0x2e33   :  { %p3631_p9 = scmp.ne.s32.totalorder %s4188_s9, %s3630_s19  ;;  %p3634_p10 = scmp.lt.u32.totalorder %s3630_s19, %s4188_s9 }
0x2e35   :  { %p3636_p11 = pnand %p3634_p10, %p3631_p9 }
0x2e37   :  { %3639 = shalt.err (!%p3636_p11)
}
0x2e38   :  { %2769 = dma.vmem_to_hbm [thread:$0]  %s2767_s15, 32, %s4188_s9, [#allocation4]  }
0x2e39   :  { %3646 = dma.done.wait [#allocation4], 32  }
0x2e3a   :  { %3647 = vsyncadd [#allocation4], 4294967264 }
0x2e3b   :  { %2773 = vsyncpa [#allocation3], 1 }
0x2e3c   :  { %2774 = vsyncpa [#allocation6], 1 }
0x2e3d   :  { %2775 = vsyncpa [#allocation9], 1 }
0x2e3e   :  { %2776 = vsyncpa [#allocation4], 1 }

</bundles_post_ra>
